<compile_context>
chip_gen: v6e
topology: v6e:2x2x1
jax: 0.10.0
libtpu: 0.0.40
codegen_flags: <defaults>
</compile_context>

<pallas_src>
import functools

import jax
import jax.numpy as jnp
from jax.experimental import pallas as pl
from jax.experimental.pallas import tpu as pltpu


def _round_up(n, m):
    return ((n + m - 1) // m) * m


def _picnn_fused_kernel(x0_ref, p0_ref,
                        waT_ref, ba_ref,
                        wbT_ref,
                        wuT_ref, bu_ref,
                        wvT_ref, bv_ref,
                        wwT_ref, bw_ref,
                        wlT_ref, bl_ref,
                        out_ref, *, n_layers):
    """Full PICNN forward for one batch tile. All layer weights are VMEM-resident,
    stacked along a leading layer axis; the layer loop is a static Python loop."""
    x0 = x0_ref[...]            # (Bt, K)   original input (zero-padded beyond k0)
    x = x0                      # (Bt, K)   running output-net activation
    p = p0_ref[...]             # (Bt, P)   running param-net activation

    for j in range(n_layers):
        # Parameter heads (weights already transposed to (in, out) in the wrapper).
        u = jnp.maximum(
            jnp.dot(p, wuT_ref[j], preferred_element_type=jnp.float32) + bu_ref[j], 0.0)
        v = jnp.dot(p, wvT_ref[j], preferred_element_type=jnp.float32) + bv_ref[j]
        w = jnp.dot(p, wwT_ref[j], preferred_element_type=jnp.float32) + bw_ref[j]

        # Propagation: exp() of the constrained weights is precomputed in the wrapper.
        prop = jnp.dot(x * u, waT_ref[j], preferred_element_type=jnp.float32) + ba_ref[j]
        # Residual connection from the original input, no bias.
        res = jnp.dot(x0 * v, wbT_ref[j], preferred_element_type=jnp.float32)

        z = prop + res + w
        x = z if j == n_layers - 1 else jnp.maximum(z, 0.0)

        # Param-net forward propagation (Linear + ReLU); skipped on the last stage
        # because its result is discarded.
        if j < n_layers - 1:
            p = jnp.maximum(
                jnp.dot(p, wlT_ref[j], preferred_element_type=jnp.float32) + bl_ref[j], 0.0)

    out_ref[...] = x


def picnn_forward(x, eta, layers, *, batch_tile=128):
    """PICNN forward pass. x: (B, k0), eta: (B, p0)."""
    n_layers = len(layers)
    batch, k0 = x.shape
    p0 = eta.shape[1]

    k_dims = [k0] + [layer[0].shape[0] for layer in layers]   # wa: (k_{j+1}, k_j)
    p_dims = [p0] + [layer[9].shape[0] for layer in layers]   # wl: (p_{j+1}, p_j)
    K = _round_up(max(k_dims), 128)
    P = _round_up(max(p_dims), 128)

    def pad2(a, rows, cols):
        return jnp.pad(a, ((0, rows - a.shape[0]), (0, cols - a.shape[1])))

    # Pre-transpose to (in, out), precompute exp(wa), zero-pad, stack over layers.
    waT_l, ba_l, wbT_l = [], [], []
    wuT_l, bu_l, wvT_l, bv_l, wwT_l, bw_l = [], [], [], [], [], []
    wlT_l, bl_l = [], []
    for (wa, ba_, wb, wu, bu_, wv, bv_, ww, bw_, wl, bl_) in layers:
        waT_l.append(pad2(jnp.exp(wa).T, K, K))   # exp hoisted out of the kernel
        ba_l.append(pad2(ba_, 1, K))
        wbT_l.append(pad2(wb.T, K, K))
        wuT_l.append(pad2(wu.T, P, K))
        bu_l.append(pad2(bu_, 1, K))
        wvT_l.append(pad2(wv.T, P, K))
        bv_l.append(pad2(bv_, 1, K))
        wwT_l.append(pad2(ww.T, P, K))
        bw_l.append(pad2(bw_, 1, K))
        wlT_l.append(pad2(wl.T, P, P))
        bl_l.append(pad2(bl_, 1, P))

    waT = jnp.stack(waT_l); ba = jnp.stack(ba_l); wbT = jnp.stack(wbT_l)
    wuT = jnp.stack(wuT_l); bu = jnp.stack(bu_l)
    wvT = jnp.stack(wvT_l); bv = jnp.stack(bv_l)
    wwT = jnp.stack(wwT_l); bw = jnp.stack(bw_l)
    wlT = jnp.stack(wlT_l); bl = jnp.stack(bl_l)
    weight_args = (waT, ba, wbT, wuT, bu, wvT, bv, wwT, bw, wlT, bl)

    # Batch tiling: sublane-aligned tile, padded batch, "parallel" grid axis.
    b_tile = min(batch_tile, _round_up(batch, 8))
    b_pad = _round_up(batch, b_tile)
    x_p = jnp.pad(x.astype(jnp.float32), ((0, b_pad - batch), (0, K - k0)))
    eta_p = jnp.pad(eta.astype(jnp.float32), ((0, b_pad - batch), (0, P - p0)))

    grid = (b_pad // b_tile,)
    act_x_spec = pl.BlockSpec((b_tile, K), lambda b: (b, 0))
    act_p_spec = pl.BlockSpec((b_tile, P), lambda b: (b, 0))

    def full_spec(a):
        nd = a.ndim
        # Constant block index across the batch grid -> weights stay VMEM-resident.
        return pl.BlockSpec(a.shape, lambda b, _nd=nd: (0,) * _nd)

    in_specs = [act_x_spec, act_p_spec] + [full_spec(a) for a in weight_args]
    out_spec = pl.BlockSpec((b_tile, K), lambda b: (b, 0))
    out_shape = jax.ShapeDtypeStruct((b_pad, K), jnp.float32)

    out = pl.pallas_call(
        functools.partial(_picnn_fused_kernel, n_layers=n_layers),
        grid=grid,
        in_specs=in_specs,
        out_specs=out_spec,
        out_shape=out_shape,
        compiler_params=pltpu.CompilerParams(
            dimension_semantics=("parallel",)),
    )(x_p, eta_p, *weight_args)

    return out[:batch, :k_dims[-1]]


def _init_picnn_params(key, output_net_size, param_net_size):
    assert len(output_net_size) == len(param_net_size)
    ks = output_net_size
    ps = param_net_size
    layers = []
    for j in range(len(ks) - 1):
        key, *subs = jax.random.split(key, 12)
        kj, kj1, k0 = ks[j], ks[j + 1], ks[0]
        pj, pj1 = ps[j], ps[j + 1]
        wa = 0.3 * jax.random.normal(subs[0], (kj1, kj), jnp.float32) - 1.5  # exp() constraint applied in wrapper
        ba = 0.1 * jax.random.normal(subs[1], (1, kj1), jnp.float32)
        wb = 0.2 * jax.random.normal(subs[2], (kj1, k0), jnp.float32)
        wu = 0.2 * jax.random.normal(subs[3], (kj, pj), jnp.float32)
        bu = 0.1 * jax.random.normal(subs[4], (1, kj), jnp.float32)
        wv = 0.2 * jax.random.normal(subs[5], (k0, pj), jnp.float32)
        bv = 0.1 * jax.random.normal(subs[6], (1, k0), jnp.float32)
        ww = 0.2 * jax.random.normal(subs[7], (kj1, pj), jnp.float32)
        bw = 0.1 * jax.random.normal(subs[8], (1, kj1), jnp.float32)
        wl = 0.2 * jax.random.normal(subs[9], (pj1, pj), jnp.float32)
        bl = 0.1 * jax.random.normal(subs[10], (1, pj1), jnp.float32)
        layers.append((wa, ba, wb, wu, bu, wv, bv, ww, bw, wl, bl))
    return layers


def _picnn_forward_ref(x, eta, layers):
    """Pure-JAX reference for correctness checking."""
    x0 = x
    inter = x
    p = eta
    n = len(layers)
    for j, (wa, ba, wb, wu, bu, wv, bv, ww, bw, wl, bl) in enumerate(layers):
        u = jnp.maximum(p @ wu.T + bu, 0.0)
        v = p @ wv.T + bv
        w = p @ ww.T + bw
        z = (inter * u) @ jnp.exp(wa).T + ba + (x0 * v) @ wb.T + w
        inter = z if j == n - 1 else jnp.maximum(z, 0.0)
        p = jnp.maximum(p @ wl.T + bl, 0.0)
    return inter


if __name__ == "__main__":
    # Small sizes: J+1 = 3 stages.
    output_net_size = (4, 32, 32, 4)   # (k0, k1, k2, k3)
    param_net_size = (8, 16, 16, 8)    # (p0, p1, p2, p3)
    batch = 2

    key = jax.random.PRNGKey(0)
    kx, keta, kparams = jax.random.split(key, 3)

    x = jax.random.normal(kx, (batch, output_net_size[0]), jnp.float32)
    eta = jax.random.normal(keta, (batch, param_net_size[0]), jnp.float32)
    layers = _init_picnn_params(kparams, output_net_size, param_net_size)

    out = picnn_forward(x, eta, layers)
    out = jax.block_until_ready(out)

    ref = _picnn_forward_ref(x, eta, layers)
    assert out.shape == (batch, output_net_size[-1])
    assert jnp.allclose(out, ref, rtol=1e-5, atol=1e-4), "Pallas kernel mismatch vs reference"

    print("KERNEL_OK")
</pallas_src>

<mosaic_0001>
module attributes {stable_mosaic.version = 11 : i64} {
  func.func @_picnn_fused_kernel(%arg0: i32, %arg1: memref<8x128xf32, #tpu.memory_space<vmem>>, %arg2: memref<8x128xf32, #tpu.memory_space<vmem>>, %arg3: memref<3x128x128xf32, #tpu.memory_space<vmem>>, %arg4: memref<3x1x128xf32, #tpu.memory_space<vmem>>, %arg5: memref<3x128x128xf32, #tpu.memory_space<vmem>>, %arg6: memref<3x128x128xf32, #tpu.memory_space<vmem>>, %arg7: memref<3x1x128xf32, #tpu.memory_space<vmem>>, %arg8: memref<3x128x128xf32, #tpu.memory_space<vmem>>, %arg9: memref<3x1x128xf32, #tpu.memory_space<vmem>>, %arg10: memref<3x128x128xf32, #tpu.memory_space<vmem>>, %arg11: memref<3x1x128xf32, #tpu.memory_space<vmem>>, %arg12: memref<3x128x128xf32, #tpu.memory_space<vmem>>, %arg13: memref<3x1x128xf32, #tpu.memory_space<vmem>>, %arg14: memref<8x128xf32, #tpu.memory_space<vmem>>) attributes {dimension_semantics = [#tpu.dimension_semantics<parallel>], iteration_bounds = array<i64: 1>, scalar_prefetch = 0 : i64, scratch_operands = 0 : i64, tpu.core_type = #tpu.core_type<tc>, window_params = [{transform_indices = @transform_0, window_bounds = array<i64: 8, 128>}, {transform_indices = @transform_1, window_bounds = array<i64: 8, 128>}, {pipeline_mode = #tpu.pipeline_mode<synchronous>, transform_indices = @transform_2, window_bounds = array<i64: 3, 128, 128>}, {pipeline_mode = #tpu.pipeline_mode<synchronous>, transform_indices = @transform_3, window_bounds = array<i64: 3, 1, 128>}, {pipeline_mode = #tpu.pipeline_mode<synchronous>, transform_indices = @transform_4, window_bounds = array<i64: 3, 128, 128>}, {pipeline_mode = #tpu.pipeline_mode<synchronous>, transform_indices = @transform_5, window_bounds = array<i64: 3, 128, 128>}, {pipeline_mode = #tpu.pipeline_mode<synchronous>, transform_indices = @transform_6, window_bounds = array<i64: 3, 1, 128>}, {pipeline_mode = #tpu.pipeline_mode<synchronous>, transform_indices = @transform_7, window_bounds = array<i64: 3, 128, 128>}, {pipeline_mode = #tpu.pipeline_mode<synchronous>, transform_indices = @transform_8, window_bounds = array<i64: 3, 1, 128>}, {pipeline_mode = #tpu.pipeline_mode<synchronous>, transform_indices = @transform_9, window_bounds = array<i64: 3, 128, 128>}, {pipeline_mode = #tpu.pipeline_mode<synchronous>, transform_indices = @transform_10, window_bounds = array<i64: 3, 1, 128>}, {pipeline_mode = #tpu.pipeline_mode<synchronous>, transform_indices = @transform_11, window_bounds = array<i64: 3, 128, 128>}, {pipeline_mode = #tpu.pipeline_mode<synchronous>, transform_indices = @transform_12, window_bounds = array<i64: 3, 1, 128>}, {transform_indices = @transform_13, window_bounds = array<i64: 8, 128>}]} {
    %c0 = arith.constant 0 : index
    %c0_0 = arith.constant 0 : index
    %0 = vector.load %arg1[%c0, %c0_0] : memref<8x128xf32, #tpu.memory_space<vmem>>, vector<8x128xf32>
    %c0_1 = arith.constant 0 : index
    %c0_2 = arith.constant 0 : index
    %1 = vector.load %arg2[%c0_1, %c0_2] : memref<8x128xf32, #tpu.memory_space<vmem>>, vector<8x128xf32>
    %c0_3 = arith.constant 0 : index
    %c0_4 = arith.constant 0 : index
    %c0_5 = arith.constant 0 : index
    %2 = vector.load %arg6[%c0_3, %c0_4, %c0_5] : memref<3x128x128xf32, #tpu.memory_space<vmem>>, vector<1x128x128xf32>
    %3 = vector.shape_cast %2 : vector<1x128x128xf32> to vector<128x128xf32>
    %cst = arith.constant dense<0.000000e+00> : vector<8x128xf32>
    %4 = tpu.matmul %1, %3, %cst {dimension_numbers = #tpu.dot_dimension_numbers<[1], [0], [0], [1], [0, 0, 1, 1], [], []>} : vector<8x128xf32>, vector<128x128xf32>, vector<8x128xf32> -> vector<8x128xf32>
    %c0_6 = arith.constant 0 : index
    %c0_7 = arith.constant 0 : index
    %c0_8 = arith.constant 0 : index
    %5 = vector.load %arg7[%c0_6, %c0_7, %c0_8] : memref<3x1x128xf32, #tpu.memory_space<vmem>>, vector<1x1x128xf32>
    %6 = vector.shape_cast %5 : vector<1x1x128xf32> to vector<1x128xf32>
    %7 = vector.broadcast %6 : vector<1x128xf32> to vector<8x128xf32>
    %8 = arith.addf %4, %7 : vector<8x128xf32>
    %cst_9 = arith.constant 0.000000e+00 : f32
    %9 = vector.broadcast %cst_9 : f32 to vector<8x128xf32>
    %10 = arith.maximumf %8, %9 : vector<8x128xf32>
    %c0_10 = arith.constant 0 : index
    %c0_11 = arith.constant 0 : index
    %c0_12 = arith.constant 0 : index
    %11 = vector.load %arg8[%c0_10, %c0_11, %c0_12] : memref<3x128x128xf32, #tpu.memory_space<vmem>>, vector<1x128x128xf32>
    %12 = vector.shape_cast %11 : vector<1x128x128xf32> to vector<128x128xf32>
    %cst_13 = arith.constant dense<0.000000e+00> : vector<8x128xf32>
    %13 = tpu.matmul %1, %12, %cst_13 {dimension_numbers = #tpu.dot_dimension_numbers<[1], [0], [0], [1], [0, 0, 1, 1], [], []>} : vector<8x128xf32>, vector<128x128xf32>, vector<8x128xf32> -> vector<8x128xf32>
    %c0_14 = arith.constant 0 : index
    %c0_15 = arith.constant 0 : index
    %c0_16 = arith.constant 0 : index
    %14 = vector.load %arg9[%c0_14, %c0_15, %c0_16] : memref<3x1x128xf32, #tpu.memory_space<vmem>>, vector<1x1x128xf32>
    %15 = vector.shape_cast %14 : vector<1x1x128xf32> to vector<1x128xf32>
    %16 = vector.broadcast %15 : vector<1x128xf32> to vector<8x128xf32>
    %17 = arith.addf %13, %16 : vector<8x128xf32>
    %c0_17 = arith.constant 0 : index
    %c0_18 = arith.constant 0 : index
    %c0_19 = arith.constant 0 : index
    %18 = vector.load %arg10[%c0_17, %c0_18, %c0_19] : memref<3x128x128xf32, #tpu.memory_space<vmem>>, vector<1x128x128xf32>
    %19 = vector.shape_cast %18 : vector<1x128x128xf32> to vector<128x128xf32>
    %cst_20 = arith.constant dense<0.000000e+00> : vector<8x128xf32>
    %20 = tpu.matmul %1, %19, %cst_20 {dimension_numbers = #tpu.dot_dimension_numbers<[1], [0], [0], [1], [0, 0, 1, 1], [], []>} : vector<8x128xf32>, vector<128x128xf32>, vector<8x128xf32> -> vector<8x128xf32>
    %c0_21 = arith.constant 0 : index
    %c0_22 = arith.constant 0 : index
    %c0_23 = arith.constant 0 : index
    %21 = vector.load %arg11[%c0_21, %c0_22, %c0_23] : memref<3x1x128xf32, #tpu.memory_space<vmem>>, vector<1x1x128xf32>
    %22 = vector.shape_cast %21 : vector<1x1x128xf32> to vector<1x128xf32>
    %23 = vector.broadcast %22 : vector<1x128xf32> to vector<8x128xf32>
    %24 = arith.addf %20, %23 : vector<8x128xf32>
    %25 = arith.mulf %0, %10 : vector<8x128xf32>
    %c0_24 = arith.constant 0 : index
    %c0_25 = arith.constant 0 : index
    %c0_26 = arith.constant 0 : index
    %26 = vector.load %arg3[%c0_24, %c0_25, %c0_26] : memref<3x128x128xf32, #tpu.memory_space<vmem>>, vector<1x128x128xf32>
    %27 = vector.shape_cast %26 : vector<1x128x128xf32> to vector<128x128xf32>
    %cst_27 = arith.constant dense<0.000000e+00> : vector<8x128xf32>
    %28 = tpu.matmul %25, %27, %cst_27 {dimension_numbers = #tpu.dot_dimension_numbers<[1], [0], [0], [1], [0, 0, 1, 1], [], []>} : vector<8x128xf32>, vector<128x128xf32>, vector<8x128xf32> -> vector<8x128xf32>
    %c0_28 = arith.constant 0 : index
    %c0_29 = arith.constant 0 : index
    %c0_30 = arith.constant 0 : index
    %29 = vector.load %arg4[%c0_28, %c0_29, %c0_30] : memref<3x1x128xf32, #tpu.memory_space<vmem>>, vector<1x1x128xf32>
    %30 = vector.shape_cast %29 : vector<1x1x128xf32> to vector<1x128xf32>
    %31 = vector.broadcast %30 : vector<1x128xf32> to vector<8x128xf32>
    %32 = arith.addf %28, %31 : vector<8x128xf32>
    %33 = arith.mulf %0, %17 : vector<8x128xf32>
    %c0_31 = arith.constant 0 : index
    %c0_32 = arith.constant 0 : index
    %c0_33 = arith.constant 0 : index
    %34 = vector.load %arg5[%c0_31, %c0_32, %c0_33] : memref<3x128x128xf32, #tpu.memory_space<vmem>>, vector<1x128x128xf32>
    %35 = vector.shape_cast %34 : vector<1x128x128xf32> to vector<128x128xf32>
    %cst_34 = arith.constant dense<0.000000e+00> : vector<8x128xf32>
    %36 = tpu.matmul %33, %35, %cst_34 {dimension_numbers = #tpu.dot_dimension_numbers<[1], [0], [0], [1], [0, 0, 1, 1], [], []>} : vector<8x128xf32>, vector<128x128xf32>, vector<8x128xf32> -> vector<8x128xf32>
    %37 = arith.addf %32, %36 : vector<8x128xf32>
    %38 = arith.addf %37, %24 : vector<8x128xf32>
    %cst_35 = arith.constant 0.000000e+00 : f32
    %39 = vector.broadcast %cst_35 : f32 to vector<8x128xf32>
    %40 = arith.maximumf %38, %39 : vector<8x128xf32>
    %c0_36 = arith.constant 0 : index
    %c0_37 = arith.constant 0 : index
    %c0_38 = arith.constant 0 : index
    %41 = vector.load %arg12[%c0_36, %c0_37, %c0_38] : memref<3x128x128xf32, #tpu.memory_space<vmem>>, vector<1x128x128xf32>
    %42 = vector.shape_cast %41 : vector<1x128x128xf32> to vector<128x128xf32>
    %cst_39 = arith.constant dense<0.000000e+00> : vector<8x128xf32>
    %43 = tpu.matmul %1, %42, %cst_39 {dimension_numbers = #tpu.dot_dimension_numbers<[1], [0], [0], [1], [0, 0, 1, 1], [], []>} : vector<8x128xf32>, vector<128x128xf32>, vector<8x128xf32> -> vector<8x128xf32>
    %c0_40 = arith.constant 0 : index
    %c0_41 = arith.constant 0 : index
    %c0_42 = arith.constant 0 : index
    %44 = vector.load %arg13[%c0_40, %c0_41, %c0_42] : memref<3x1x128xf32, #tpu.memory_space<vmem>>, vector<1x1x128xf32>
    %45 = vector.shape_cast %44 : vector<1x1x128xf32> to vector<1x128xf32>
    %46 = vector.broadcast %45 : vector<1x128xf32> to vector<8x128xf32>
    %47 = arith.addf %43, %46 : vector<8x128xf32>
    %cst_43 = arith.constant 0.000000e+00 : f32
    %48 = vector.broadcast %cst_43 : f32 to vector<8x128xf32>
    %49 = arith.maximumf %47, %48 : vector<8x128xf32>
    %c1 = arith.constant 1 : index
    %c0_44 = arith.constant 0 : index
    %c0_45 = arith.constant 0 : index
    %50 = vector.load %arg6[%c1, %c0_44, %c0_45] : memref<3x128x128xf32, #tpu.memory_space<vmem>>, vector<1x128x128xf32>
    %51 = vector.shape_cast %50 : vector<1x128x128xf32> to vector<128x128xf32>
    %cst_46 = arith.constant dense<0.000000e+00> : vector<8x128xf32>
    %52 = tpu.matmul %49, %51, %cst_46 {dimension_numbers = #tpu.dot_dimension_numbers<[1], [0], [0], [1], [0, 0, 1, 1], [], []>} : vector<8x128xf32>, vector<128x128xf32>, vector<8x128xf32> -> vector<8x128xf32>
    %c1_47 = arith.constant 1 : index
    %c0_48 = arith.constant 0 : index
    %c0_49 = arith.constant 0 : index
    %53 = vector.load %arg7[%c1_47, %c0_48, %c0_49] : memref<3x1x128xf32, #tpu.memory_space<vmem>>, vector<1x1x128xf32>
    %54 = vector.shape_cast %53 : vector<1x1x128xf32> to vector<1x128xf32>
    %55 = vector.broadcast %54 : vector<1x128xf32> to vector<8x128xf32>
    %56 = arith.addf %52, %55 : vector<8x128xf32>
    %cst_50 = arith.constant 0.000000e+00 : f32
    %57 = vector.broadcast %cst_50 : f32 to vector<8x128xf32>
    %58 = arith.maximumf %56, %57 : vector<8x128xf32>
    %c1_51 = arith.constant 1 : index
    %c0_52 = arith.constant 0 : index
    %c0_53 = arith.constant 0 : index
    %59 = vector.load %arg8[%c1_51, %c0_52, %c0_53] : memref<3x128x128xf32, #tpu.memory_space<vmem>>, vector<1x128x128xf32>
    %60 = vector.shape_cast %59 : vector<1x128x128xf32> to vector<128x128xf32>
    %cst_54 = arith.constant dense<0.000000e+00> : vector<8x128xf32>
    %61 = tpu.matmul %49, %60, %cst_54 {dimension_numbers = #tpu.dot_dimension_numbers<[1], [0], [0], [1], [0, 0, 1, 1], [], []>} : vector<8x128xf32>, vector<128x128xf32>, vector<8x128xf32> -> vector<8x128xf32>
    %c1_55 = arith.constant 1 : index
    %c0_56 = arith.constant 0 : index
    %c0_57 = arith.constant 0 : index
    %62 = vector.load %arg9[%c1_55, %c0_56, %c0_57] : memref<3x1x128xf32, #tpu.memory_space<vmem>>, vector<1x1x128xf32>
    %63 = vector.shape_cast %62 : vector<1x1x128xf32> to vector<1x128xf32>
    %64 = vector.broadcast %63 : vector<1x128xf32> to vector<8x128xf32>
    %65 = arith.addf %61, %64 : vector<8x128xf32>
    %c1_58 = arith.constant 1 : index
    %c0_59 = arith.constant 0 : index
    %c0_60 = arith.constant 0 : index
    %66 = vector.load %arg10[%c1_58, %c0_59, %c0_60] : memref<3x128x128xf32, #tpu.memory_space<vmem>>, vector<1x128x128xf32>
    %67 = vector.shape_cast %66 : vector<1x128x128xf32> to vector<128x128xf32>
    %cst_61 = arith.constant dense<0.000000e+00> : vector<8x128xf32>
    %68 = tpu.matmul %49, %67, %cst_61 {dimension_numbers = #tpu.dot_dimension_numbers<[1], [0], [0], [1], [0, 0, 1, 1], [], []>} : vector<8x128xf32>, vector<128x128xf32>, vector<8x128xf32> -> vector<8x128xf32>
    %c1_62 = arith.constant 1 : index
    %c0_63 = arith.constant 0 : index
    %c0_64 = arith.constant 0 : index
    %69 = vector.load %arg11[%c1_62, %c0_63, %c0_64] : memref<3x1x128xf32, #tpu.memory_space<vmem>>, vector<1x1x128xf32>
    %70 = vector.shape_cast %69 : vector<1x1x128xf32> to vector<1x128xf32>
    %71 = vector.broadcast %70 : vector<1x128xf32> to vector<8x128xf32>
    %72 = arith.addf %68, %71 : vector<8x128xf32>
    %73 = arith.mulf %40, %58 : vector<8x128xf32>
    %c1_65 = arith.constant 1 : index
    %c0_66 = arith.constant 0 : index
    %c0_67 = arith.constant 0 : index
    %74 = vector.load %arg3[%c1_65, %c0_66, %c0_67] : memref<3x128x128xf32, #tpu.memory_space<vmem>>, vector<1x128x128xf32>
    %75 = vector.shape_cast %74 : vector<1x128x128xf32> to vector<128x128xf32>
    %cst_68 = arith.constant dense<0.000000e+00> : vector<8x128xf32>
    %76 = tpu.matmul %73, %75, %cst_68 {dimension_numbers = #tpu.dot_dimension_numbers<[1], [0], [0], [1], [0, 0, 1, 1], [], []>} : vector<8x128xf32>, vector<128x128xf32>, vector<8x128xf32> -> vector<8x128xf32>
    %c1_69 = arith.constant 1 : index
    %c0_70 = arith.constant 0 : index
    %c0_71 = arith.constant 0 : index
    %77 = vector.load %arg4[%c1_69, %c0_70, %c0_71] : memref<3x1x128xf32, #tpu.memory_space<vmem>>, vector<1x1x128xf32>
    %78 = vector.shape_cast %77 : vector<1x1x128xf32> to vector<1x128xf32>
    %79 = vector.broadcast %78 : vector<1x128xf32> to vector<8x128xf32>
    %80 = arith.addf %76, %79 : vector<8x128xf32>
    %81 = arith.mulf %0, %65 : vector<8x128xf32>
    %c1_72 = arith.constant 1 : index
    %c0_73 = arith.constant 0 : index
    %c0_74 = arith.constant 0 : index
    %82 = vector.load %arg5[%c1_72, %c0_73, %c0_74] : memref<3x128x128xf32, #tpu.memory_space<vmem>>, vector<1x128x128xf32>
    %83 = vector.shape_cast %82 : vector<1x128x128xf32> to vector<128x128xf32>
    %cst_75 = arith.constant dense<0.000000e+00> : vector<8x128xf32>
    %84 = tpu.matmul %81, %83, %cst_75 {dimension_numbers = #tpu.dot_dimension_numbers<[1], [0], [0], [1], [0, 0, 1, 1], [], []>} : vector<8x128xf32>, vector<128x128xf32>, vector<8x128xf32> -> vector<8x128xf32>
    %85 = arith.addf %80, %84 : vector<8x128xf32>
    %86 = arith.addf %85, %72 : vector<8x128xf32>
    %cst_76 = arith.constant 0.000000e+00 : f32
    %87 = vector.broadcast %cst_76 : f32 to vector<8x128xf32>
    %88 = arith.maximumf %86, %87 : vector<8x128xf32>
    %c1_77 = arith.constant 1 : index
    %c0_78 = arith.constant 0 : index
    %c0_79 = arith.constant 0 : index
    %89 = vector.load %arg12[%c1_77, %c0_78, %c0_79] : memref<3x128x128xf32, #tpu.memory_space<vmem>>, vector<1x128x128xf32>
    %90 = vector.shape_cast %89 : vector<1x128x128xf32> to vector<128x128xf32>
    %cst_80 = arith.constant dense<0.000000e+00> : vector<8x128xf32>
    %91 = tpu.matmul %49, %90, %cst_80 {dimension_numbers = #tpu.dot_dimension_numbers<[1], [0], [0], [1], [0, 0, 1, 1], [], []>} : vector<8x128xf32>, vector<128x128xf32>, vector<8x128xf32> -> vector<8x128xf32>
    %c1_81 = arith.constant 1 : index
    %c0_82 = arith.constant 0 : index
    %c0_83 = arith.constant 0 : index
    %92 = vector.load %arg13[%c1_81, %c0_82, %c0_83] : memref<3x1x128xf32, #tpu.memory_space<vmem>>, vector<1x1x128xf32>
    %93 = vector.shape_cast %92 : vector<1x1x128xf32> to vector<1x128xf32>
    %94 = vector.broadcast %93 : vector<1x128xf32> to vector<8x128xf32>
    %95 = arith.addf %91, %94 : vector<8x128xf32>
    %cst_84 = arith.constant 0.000000e+00 : f32
    %96 = vector.broadcast %cst_84 : f32 to vector<8x128xf32>
    %97 = arith.maximumf %95, %96 : vector<8x128xf32>
    %c2 = arith.constant 2 : index
    %c0_85 = arith.constant 0 : index
    %c0_86 = arith.constant 0 : index
    %98 = vector.load %arg6[%c2, %c0_85, %c0_86] : memref<3x128x128xf32, #tpu.memory_space<vmem>>, vector<1x128x128xf32>
    %99 = vector.shape_cast %98 : vector<1x128x128xf32> to vector<128x128xf32>
    %cst_87 = arith.constant dense<0.000000e+00> : vector<8x128xf32>
    %100 = tpu.matmul %97, %99, %cst_87 {dimension_numbers = #tpu.dot_dimension_numbers<[1], [0], [0], [1], [0, 0, 1, 1], [], []>} : vector<8x128xf32>, vector<128x128xf32>, vector<8x128xf32> -> vector<8x128xf32>
    %c2_88 = arith.constant 2 : index
    %c0_89 = arith.constant 0 : index
    %c0_90 = arith.constant 0 : index
    %101 = vector.load %arg7[%c2_88, %c0_89, %c0_90] : memref<3x1x128xf32, #tpu.memory_space<vmem>>, vector<1x1x128xf32>
    %102 = vector.shape_cast %101 : vector<1x1x128xf32> to vector<1x128xf32>
    %103 = vector.broadcast %102 : vector<1x128xf32> to vector<8x128xf32>
    %104 = arith.addf %100, %103 : vector<8x128xf32>
    %cst_91 = arith.constant 0.000000e+00 : f32
    %105 = vector.broadcast %cst_91 : f32 to vector<8x128xf32>
    %106 = arith.maximumf %104, %105 : vector<8x128xf32>
    %c2_92 = arith.constant 2 : index
    %c0_93 = arith.constant 0 : index
    %c0_94 = arith.constant 0 : index
    %107 = vector.load %arg8[%c2_92, %c0_93, %c0_94] : memref<3x128x128xf32, #tpu.memory_space<vmem>>, vector<1x128x128xf32>
    %108 = vector.shape_cast %107 : vector<1x128x128xf32> to vector<128x128xf32>
    %cst_95 = arith.constant dense<0.000000e+00> : vector<8x128xf32>
    %109 = tpu.matmul %97, %108, %cst_95 {dimension_numbers = #tpu.dot_dimension_numbers<[1], [0], [0], [1], [0, 0, 1, 1], [], []>} : vector<8x128xf32>, vector<128x128xf32>, vector<8x128xf32> -> vector<8x128xf32>
    %c2_96 = arith.constant 2 : index
    %c0_97 = arith.constant 0 : index
    %c0_98 = arith.constant 0 : index
    %110 = vector.load %arg9[%c2_96, %c0_97, %c0_98] : memref<3x1x128xf32, #tpu.memory_space<vmem>>, vector<1x1x128xf32>
    %111 = vector.shape_cast %110 : vector<1x1x128xf32> to vector<1x128xf32>
    %112 = vector.broadcast %111 : vector<1x128xf32> to vector<8x128xf32>
    %113 = arith.addf %109, %112 : vector<8x128xf32>
    %c2_99 = arith.constant 2 : index
    %c0_100 = arith.constant 0 : index
    %c0_101 = arith.constant 0 : index
    %114 = vector.load %arg10[%c2_99, %c0_100, %c0_101] : memref<3x128x128xf32, #tpu.memory_space<vmem>>, vector<1x128x128xf32>
    %115 = vector.shape_cast %114 : vector<1x128x128xf32> to vector<128x128xf32>
    %cst_102 = arith.constant dense<0.000000e+00> : vector<8x128xf32>
    %116 = tpu.matmul %97, %115, %cst_102 {dimension_numbers = #tpu.dot_dimension_numbers<[1], [0], [0], [1], [0, 0, 1, 1], [], []>} : vector<8x128xf32>, vector<128x128xf32>, vector<8x128xf32> -> vector<8x128xf32>
    %c2_103 = arith.constant 2 : index
    %c0_104 = arith.constant 0 : index
    %c0_105 = arith.constant 0 : index
    %117 = vector.load %arg11[%c2_103, %c0_104, %c0_105] : memref<3x1x128xf32, #tpu.memory_space<vmem>>, vector<1x1x128xf32>
    %118 = vector.shape_cast %117 : vector<1x1x128xf32> to vector<1x128xf32>
    %119 = vector.broadcast %118 : vector<1x128xf32> to vector<8x128xf32>
    %120 = arith.addf %116, %119 : vector<8x128xf32>
    %121 = arith.mulf %88, %106 : vector<8x128xf32>
    %c2_106 = arith.constant 2 : index
    %c0_107 = arith.constant 0 : index
    %c0_108 = arith.constant 0 : index
    %122 = vector.load %arg3[%c2_106, %c0_107, %c0_108] : memref<3x128x128xf32, #tpu.memory_space<vmem>>, vector<1x128x128xf32>
    %123 = vector.shape_cast %122 : vector<1x128x128xf32> to vector<128x128xf32>
    %cst_109 = arith.constant dense<0.000000e+00> : vector<8x128xf32>
    %124 = tpu.matmul %121, %123, %cst_109 {dimension_numbers = #tpu.dot_dimension_numbers<[1], [0], [0], [1], [0, 0, 1, 1], [], []>} : vector<8x128xf32>, vector<128x128xf32>, vector<8x128xf32> -> vector<8x128xf32>
    %c2_110 = arith.constant 2 : index
    %c0_111 = arith.constant 0 : index
    %c0_112 = arith.constant 0 : index
    %125 = vector.load %arg4[%c2_110, %c0_111, %c0_112] : memref<3x1x128xf32, #tpu.memory_space<vmem>>, vector<1x1x128xf32>
    %126 = vector.shape_cast %125 : vector<1x1x128xf32> to vector<1x128xf32>
    %127 = vector.broadcast %126 : vector<1x128xf32> to vector<8x128xf32>
    %128 = arith.addf %124, %127 : vector<8x128xf32>
    %129 = arith.mulf %0, %113 : vector<8x128xf32>
    %c2_113 = arith.constant 2 : index
    %c0_114 = arith.constant 0 : index
    %c0_115 = arith.constant 0 : index
    %130 = vector.load %arg5[%c2_113, %c0_114, %c0_115] : memref<3x128x128xf32, #tpu.memory_space<vmem>>, vector<1x128x128xf32>
    %131 = vector.shape_cast %130 : vector<1x128x128xf32> to vector<128x128xf32>
    %cst_116 = arith.constant dense<0.000000e+00> : vector<8x128xf32>
    %132 = tpu.matmul %129, %131, %cst_116 {dimension_numbers = #tpu.dot_dimension_numbers<[1], [0], [0], [1], [0, 0, 1, 1], [], []>} : vector<8x128xf32>, vector<128x128xf32>, vector<8x128xf32> -> vector<8x128xf32>
    %133 = arith.addf %128, %132 : vector<8x128xf32>
    %134 = arith.addf %133, %120 : vector<8x128xf32>
    %c0_117 = arith.constant 0 : index
    %c0_118 = arith.constant 0 : index
    %135 = vector.load %arg14[%c0_117, %c0_118] : memref<8x128xf32, #tpu.memory_space<vmem>>, vector<8x128xf32>
    tpu.vector_store %arg14[%c0_117, %c0_118], %134 {strides = array<i32>} : memref<8x128xf32, #tpu.memory_space<vmem>>, vector<8x128xf32>,
    return
  }
  func.func @transform_0(%arg0: i32) -> (i32, i32) {
    %c0_i32 = arith.constant 0 : i32
    %c0_i32_0 = arith.constant 0 : i32
    return %arg0, %c0_i32 : i32, i32
  }
  func.func @transform_1(%arg0: i32) -> (i32, i32) {
    %c0_i32 = arith.constant 0 : i32
    %c0_i32_0 = arith.constant 0 : i32
    return %arg0, %c0_i32 : i32, i32
  }
  func.func @transform_2(%arg0: i32) -> (i32, i32, i32) {
    %c0_i32 = arith.constant 0 : i32
    %c0_i32_0 = arith.constant 0 : i32
    %c0_i32_1 = arith.constant 0 : i32
    %c0_i32_2 = arith.constant 0 : i32
    return %c0_i32, %c0_i32_0, %c0_i32_1 : i32, i32, i32
  }
  func.func @transform_3(%arg0: i32) -> (i32, i32, i32) {
    %c0_i32 = arith.constant 0 : i32
    %c0_i32_0 = arith.constant 0 : i32
    %c0_i32_1 = arith.constant 0 : i32
    %c0_i32_2 = arith.constant 0 : i32
    return %c0_i32, %c0_i32_0, %c0_i32_1 : i32, i32, i32
  }
  func.func @transform_4(%arg0: i32) -> (i32, i32, i32) {
    %c0_i32 = arith.constant 0 : i32
    %c0_i32_0 = arith.constant 0 : i32
    %c0_i32_1 = arith.constant 0 : i32
    %c0_i32_2 = arith.constant 0 : i32
    return %c0_i32, %c0_i32_0, %c0_i32_1 : i32, i32, i32
  }
  func.func @transform_5(%arg0: i32) -> (i32, i32, i32) {
    %c0_i32 = arith.constant 0 : i32
    %c0_i32_0 = arith.constant 0 : i32
    %c0_i32_1 = arith.constant 0 : i32
    %c0_i32_2 = arith.constant 0 : i32
    return %c0_i32, %c0_i32_0, %c0_i32_1 : i32, i32, i32
  }
  func.func @transform_6(%arg0: i32) -> (i32, i32, i32) {
    %c0_i32 = arith.constant 0 : i32
    %c0_i32_0 = arith.constant 0 : i32
    %c0_i32_1 = arith.constant 0 : i32
    %c0_i32_2 = arith.constant 0 : i32
    return %c0_i32, %c0_i32_0, %c0_i32_1 : i32, i32, i32
  }
  func.func @transform_7(%arg0: i32) -> (i32, i32, i32) {
    %c0_i32 = arith.constant 0 : i32
    %c0_i32_0 = arith.constant 0 : i32
    %c0_i32_1 = arith.constant 0 : i32
    %c0_i32_2 = arith.constant 0 : i32
    return %c0_i32, %c0_i32_0, %c0_i32_1 : i32, i32, i32
  }
  func.func @transform_8(%arg0: i32) -> (i32, i32, i32) {
    %c0_i32 = arith.constant 0 : i32
    %c0_i32_0 = arith.constant 0 : i32
    %c0_i32_1 = arith.constant 0 : i32
    %c0_i32_2 = arith.constant 0 : i32
    return %c0_i32, %c0_i32_0, %c0_i32_1 : i32, i32, i32
  }
  func.func @transform_9(%arg0: i32) -> (i32, i32, i32) {
    %c0_i32 = arith.constant 0 : i32
    %c0_i32_0 = arith.constant 0 : i32
    %c0_i32_1 = arith.constant 0 : i32
    %c0_i32_2 = arith.constant 0 : i32
    return %c0_i32, %c0_i32_0, %c0_i32_1 : i32, i32, i32
  }
  func.func @transform_10(%arg0: i32) -> (i32, i32, i32) {
    %c0_i32 = arith.constant 0 : i32
    %c0_i32_0 = arith.constant 0 : i32
    %c0_i32_1 = arith.constant 0 : i32
    %c0_i32_2 = arith.constant 0 : i32
    return %c0_i32, %c0_i32_0, %c0_i32_1 : i32, i32, i32
  }
  func.func @transform_11(%arg0: i32) -> (i32, i32, i32) {
    %c0_i32 = arith.constant 0 : i32
    %c0_i32_0 = arith.constant 0 : i32
    %c0_i32_1 = arith.constant 0 : i32
    %c0_i32_2 = arith.constant 0 : i32
    return %c0_i32, %c0_i32_0, %c0_i32_1 : i32, i32, i32
  }
  func.func @transform_12(%arg0: i32) -> (i32, i32, i32) {
    %c0_i32 = arith.constant 0 : i32
    %c0_i32_0 = arith.constant 0 : i32
    %c0_i32_1 = arith.constant 0 : i32
    %c0_i32_2 = arith.constant 0 : i32
    return %c0_i32, %c0_i32_0, %c0_i32_1 : i32, i32, i32
  }
  func.func @transform_13(%arg0: i32) -> (i32, i32) {
    %c0_i32 = arith.constant 0 : i32
    %c0_i32_0 = arith.constant 0 : i32
    return %arg0, %c0_i32 : i32, i32
  }
}

</mosaic_0001>

<bundles_post_ra>
// kernel: tpu_custom_call.1
= control target key start
LH: loop header
LB: loop body
LE: loop exit
PB: predicated region body
PF: predicated region fallthrough
CT: control target
= control target key end

     0   :  { %18 = vsyncpa [#allocation3], 0  ;;  %s3394_s0 = inlined_call_operand.hbm [shape: f32[8,128], index: 0, kind: input, shape index: {}]   ;;  %s3395_s1 = inlined_call_operand.hbm [shape: f32[8,128], index: 1, kind: input, shape index: {}]   ;;  %s3396_s2 = inlined_call_operand.hbm [shape: f32[3,128,128], index: 2, kind: input, shape index: {}]   ;;  %s3397_s3 = inlined_call_operand.vmem [shape: f32[3,1,128], index: 3, kind: input, shape index: {}]   ;;  %s3398_s4 = inlined_call_operand.hbm [shape: f32[3,128,128], index: 4, kind: input, shape index: {}]   ;;  %s3399_s5 = inlined_call_operand.hbm [shape: f32[3,128,128], index: 5, kind: input, shape index: {}]   ;;  %s3400_s6 = inlined_call_operand.vmem [shape: f32[3,1,128], index: 6, kind: input, shape index: {}]   ;;  %s3401_s7 = inlined_call_operand.hbm [shape: f32[3,128,128], index: 7, kind: input, shape index: {}]   ;;  %s3402_s8 = inlined_call_operand.vmem [shape: f32[3,1,128], index: 8, kind: input, shape index: {}]   ;;  %s3403_s9 = inlined_call_operand.hbm [shape: f32[3,128,128], index: 9, kind: input, shape index: {}]   ;;  %s3404_s10 = inlined_call_operand.vmem [shape: f32[3,1,128], index: 10, kind: input, shape index: {}]   ;;  %s3405_s11 = inlined_call_operand.hbm [shape: f32[3,128,128], index: 11, kind: input, shape index: {}]   ;;  %s3406_s12 = inlined_call_operand.vmem [shape: f32[3,1,128], index: 12, kind: input, shape index: {}]   ;;  %s3407_s13 = inlined_call_operand.hbm [shape: f32[8,128], index: 13, kind: output, shape index: {}]  }
   0x1   :  { %19 = vsyncpa [#allocation6], 0 }
   0x2   :  { %20 = vsyncpa [#allocation9], 0 }
   0x3   :  { %21 = vsyncpa [#allocation12], 0 }
   0x4   :  { %22 = vsyncpa [#allocation15], 0 }
   0x5   :  { %23 = vsyncpa [#allocation4], 0  ;;  %s2884_s25 = smov [#allocation5]  }
   0x6   :  { %s40_s26 = sshll.u32 %s2884_s25, 4  ;;  %s41_s26 = int_to_ptr.vmem [resolvable:$true] %s40_s26 }
   0x7   :  { %s2700_s27 = scalar_lea.vmem %s41_s26, 128  ;;  %p2705_p1 = scmp.lt.s32.totalorder %s41_s26, %s41_s26 }
   0x8   :  { %p2701_p0 = scmp.ne.s32.totalorder %s41_s26, %s2700_s27  ;;  %p2706_p2 = scmp.lt.s32.totalorder %s2700_s27, %s2700_s27 }
   0xa   :  { %p2707_p3 = por %p2706_p2, %p2705_p1 }
   0xc   :  { %p2708_p4 = pnand %p2707_p3, %p2701_p0 }
   0xe   :  { %2711 = shalt.err (!%p2708_p4)
}
   0xf   :  { %43 = dma.hbm_to_vmem [thread:$0]  %s3395_s1, 128, %s41_s26, [#allocation6]  }
  0x10   :  { %s2885_s30 = smov [#allocation8]   ;;  %s2886_s15 = smov [#allocation11]  }
  0x11   :  { %s63_s14 = sshll.u32 %s2885_s30, 4  ;;  %s89_s16 = sshll.u32 %s2886_s15, 4  ;;  %s64_s14 = int_to_ptr.vmem [resolvable:$true] %s63_s14  ;;  %s90_s16 = int_to_ptr.vmem [resolvable:$true] %s89_s16 }
  0x12   :  { %s2720_s17 = scalar_lea.vmem %s64_s14, 6144  ;;  %p2725_p6 = scmp.lt.s32.totalorder %s64_s14, %s64_s14 }
  0x13   :  { %p2721_p5 = scmp.ne.s32.totalorder %s64_s14, %s2720_s17  ;;  %p2726_p7 = scmp.lt.s32.totalorder %s2720_s17, %s2720_s17 }
  0x15   :  { %p2727_p8 = por %p2726_p7, %p2725_p6 }
  0x17   :  { %p2728_p9 = pnand %p2727_p8, %p2721_p5 }
  0x19   :  { %2731 = shalt.err (!%p2728_p9)
}
  0x1a   :  { %s2887_s18 = smov 128   ;;  %s2888_s19 = smov 8  }
  0x1b   :  { %69 = dma.hbm_to_vmem [thread:$0]  %s3398_s4, 6144, %s64_s14, [#allocation9], %s2887_s18, %s2887_s18, %s2888_s19  }
  0x1c   :  { %s2740_s1 = scalar_lea.vmem %s90_s16, 6144  ;;  %p2745_p11 = scmp.lt.s32.totalorder %s90_s16, %s90_s16 }
  0x1d   :  { %p2741_p10 = scmp.ne.s32.totalorder %s90_s16, %s2740_s1  ;;  %p2746_p12 = scmp.lt.s32.totalorder %s2740_s1, %s2740_s1 }
  0x1f   :  { %p2747_p13 = por %p2746_p12, %p2745_p11 }
  0x21   :  { %p2748_p0 = pnand %p2747_p13, %p2741_p10 }
  0x23   :  { %2751 = shalt.err (!%p2748_p0)
}
  0x24   :  { %95 = dma.hbm_to_vmem [thread:$0]  %s3401_s7, 6144, %s90_s16, [#allocation12], %s2887_s18, %s2887_s18, %s2888_s19  }
  0x25   :  { %s2889_s24 = smov [#allocation2]   ;;  %s2890_s26 = smov [#allocation7]  }
  0x26   :  { %s30_s25 = sshll.u32 %s2889_s24, 4  ;;  %s49_s4 = sshll.u32 %s2890_s26, 4  ;;  %s31_s25 = int_to_ptr.vmem [resolvable:$true] %s30_s25  ;;  %s50_s4 = int_to_ptr.vmem [resolvable:$true] %s49_s4 }
  0x27   :  { %s2760_s27 = scalar_lea.vmem %s31_s25, 128  ;;  %p2765_p2 = scmp.lt.s32.totalorder %s31_s25, %s31_s25 }
  0x28   :  { %p2761_p1 = scmp.ne.s32.totalorder %s31_s25, %s2760_s27  ;;  %p2766_p3 = scmp.lt.s32.totalorder %s2760_s27, %s2760_s27 }
  0x2a   :  { %p2767_p4 = por %p2766_p3, %p2765_p2 }
  0x2c   :  { %p2768_p5 = pnand %p2767_p4, %p2761_p1 }
  0x2e   :  { %2771 = shalt.err (!%p2768_p5)
}
  0x2f   :  { %33 = dma.hbm_to_vmem [thread:$0]  %s3394_s0, 128, %s31_s25, [#allocation3]  }
  0x30   :  { %s2780_s30 = scalar_lea.vmem %s50_s4, 6144  ;;  %p2785_p7 = scmp.lt.s32.totalorder %s50_s4, %s50_s4 }
  0x31   :  { %p2781_p6 = scmp.ne.s32.totalorder %s50_s4, %s2780_s30  ;;  %p2786_p8 = scmp.lt.s32.totalorder %s2780_s30, %s2780_s30 }
  0x33   :  { %p2787_p9 = por %p2786_p8, %p2785_p7 }
  0x35   :  { %p2788_p10 = pnand %p2787_p9, %p2781_p6 }
  0x37   :  { %2791 = shalt.err (!%p2788_p10)
}
  0x38   :  { %55 = dma.hbm_to_vmem [thread:$0]  %s3396_s2, 6144, %s50_s4, [#allocation6], %s2887_s18, %s2887_s18, %s2888_s19  }
  0x39   :  { %s2891_s15 = smov [#allocation10]   ;;  %s2892_s17 = smov [#allocation13]  }
  0x3a   :  { %s75_s16 = sshll.u32 %s2891_s15, 4  ;;  %s103_s0 = sshll.u32 %s2892_s17, 4  ;;  %s76_s16 = int_to_ptr.vmem [resolvable:$true] %s75_s16  ;;  %s104_s0 = int_to_ptr.vmem [resolvable:$true] %s103_s0 }
  0x3b   :  { %s2800_s20 = scalar_lea.vmem %s76_s16, 6144  ;;  %p2805_p12 = scmp.lt.s32.totalorder %s76_s16, %s76_s16 }
  0x3c   :  { %p2801_p11 = scmp.ne.s32.totalorder %s76_s16, %s2800_s20  ;;  %p2806_p13 = scmp.lt.s32.totalorder %s2800_s20, %s2800_s20 }
  0x3e   :  { %p2807_p0 = por %p2806_p13, %p2805_p12 }
  0x40   :  { %p2808_p1 = pnand %p2807_p0, %p2801_p11 }
  0x42   :  { %2811 = shalt.err (!%p2808_p1)
}
  0x43   :  { %81 = dma.hbm_to_vmem [thread:$0]  %s3399_s5, 6144, %s76_s16, [#allocation9], %s2887_s18, %s2887_s18, %s2888_s19  }
  0x44   :  { %s2820_s2 = scalar_lea.vmem %s104_s0, 6144  ;;  %p2825_p3 = scmp.lt.s32.totalorder %s104_s0, %s104_s0 }
  0x45   :  { %p2821_p2 = scmp.ne.s32.totalorder %s104_s0, %s2820_s2  ;;  %p2826_p4 = scmp.lt.s32.totalorder %s2820_s2, %s2820_s2 }
  0x47   :  { %p2827_p5 = por %p2826_p4, %p2825_p3 }
  0x49   :  { %p2828_p6 = pnand %p2827_p5, %p2821_p2 }
  0x4b   :  { %2831 = shalt.err (!%p2828_p6)
}
  0x4c   :  { %109 = dma.hbm_to_vmem [thread:$0]  %s3403_s9, 6144, %s104_s0, [#allocation12], %s2887_s18, %s2887_s18, %s2888_s19  }
  0x4d   :  { %s2893_s24 = smov [#allocation14]  }
  0x4e   :  { %s117_s25 = sshll.u32 %s2893_s24, 4  ;;  %s118_s25 = int_to_ptr.vmem [resolvable:$true] %s117_s25 }
  0x4f   :  { %s2840_s26 = scalar_lea.vmem %s118_s25, 6144  ;;  %p2845_p8 = scmp.lt.s32.totalorder %s118_s25, %s118_s25 }
  0x50   :  { %p2841_p7 = scmp.ne.s32.totalorder %s118_s25, %s2840_s26  ;;  %p2846_p9 = scmp.lt.s32.totalorder %s2840_s26, %s2840_s26 }
  0x52   :  { %p2847_p10 = por %p2846_p9, %p2845_p8 }
  0x54   :  { %p2848_p11 = pnand %p2847_p10, %p2841_p7 }
  0x56   :  { %2851 = shalt.err (!%p2848_p11)
}
  0x57   :  { %123 = dma.hbm_to_vmem [thread:$0]  %s3405_s11, 6144, %s118_s25, [#allocation15], %s2887_s18, %s2887_s18, %s2888_s19  }
  0x58   :  { %2872 = dma.done.wait [#allocation3], 128  }
  0x59   :  { %2873 = vsyncadd [#allocation3], 4294967168 }
  0x5a   :  { %2874 = dma.done.wait [#allocation6], 6272  }
  0x5b   :  { %2875 = vsyncadd [#allocation6], 4294961024 }
  0x5c   :  { %2876 = dma.done.wait [#allocation9], 12288  }
  0x5d   :  { %2877 = vsyncadd [#allocation9], 4294955008 }
  0x5e   :  { %2878 = dma.done.wait [#allocation12], 12288  }
  0x5f   :  { %2879 = vsyncadd [#allocation12], 4294955008 }
  0x60   :  { %2880 = dma.done.wait [#allocation15], 6144  }
  0x61   :  { %2881 = vsyncadd [#allocation15], 4294961152  ;;  %v2894_v0 = vmov 0.0   ;;  %vm2895_vm0 = vmmov 0   ;;  %v167_v1 = vld [vmem:[#allocation10 + $0x78] sm:$0xff]  ;;  %v166_v2 = vld [vmem:[#allocation10 + $0x70] sm:$0xff] }
  0x62   :  { %2083 = vmatprep.subr.mxu0 %v2894_v0  ;;  %2118 = vmatprep.subr.mxu1 %v2894_v0  ;;  %v261_v3 = vld [vmem:[#allocation11 + $0x78] sm:$0xff]  ;;  %v260_v4 = vld [vmem:[#allocation11 + $0x70] sm:$0xff]  ;;  %v165_v5 = vld [vmem:[#allocation10 + $0x68] sm:$0xff]  ;;  %s2896_s9 = smov [#allocation16]  }
  0x63   :  { %2115 = vmatprep.mubr.msk.f32.mxu0 %vm2895_vm0, %v2894_v0  ;;  %2150 = vmatprep.mubr.msk.f32.mxu1 %vm2895_vm0, %v2894_v0  ;;  %v259_v6 = vld [vmem:[#allocation11 + $0x68] sm:$0xff]  ;;  %v164_v7 = vld [vmem:[#allocation10 + $0x60] sm:$0xff]  ;;  %v163_v9 = vld [vmem:[#allocation10 + $0x58] sm:$0xff]  ;;  %s1758_s11 = sshll.u32 %s2896_s9, 4  ;;  %s1759_s11 = int_to_ptr.vmem [resolvable:$true] %s1758_s11 }
  0x64   :  { %2084 = vmatpush3.msra.mxu0 %v167_v1  ;;  %2119 = vmatpush3.msra.mxu1 %v261_v3  ;;  %v258_v8 = vld [vmem:[#allocation11 + $0x60] sm:$0xff]  ;;  %v257_v10 = vld [vmem:[#allocation11 + $0x58] sm:$0xff]  ;;  %v162_v11 = vld [vmem:[#allocation10 + $0x50] sm:$0xff]  ;;  %s2852_s18 = scalar_lea.vmem %s1759_s11, 128  ;;  %p2857_p13 = scmp.lt.s32.totalorder %s1759_s11, %s1759_s11 }
  0x65   :  { %2085 = vmatprep.subr.mxu0 %v2894_v0  ;;  %2120 = vmatprep.subr.mxu1 %v2894_v0  ;;  %v256_v12 = vld [vmem:[#allocation11 + $0x50] sm:$0xff]  ;;  %v161_v13 = vld [vmem:[#allocation10 + $0x48] sm:$0xff]  ;;  %v160_v15 = vld [vmem:[#allocation10 + $0x40] sm:$0xff]  ;;  %p2853_p12 = scmp.ne.s32.totalorder %s1759_s11, %s2852_s18  ;;  %p2858_p0 = scmp.lt.s32.totalorder %s2852_s18, %s2852_s18 }
  0x66   :  { %2086 = vmatpush3.msra.mxu0 %v166_v2  ;;  %2121 = vmatpush3.msra.mxu1 %v260_v4  ;;  %v255_v14 = vld [vmem:[#allocation11 + $0x48] sm:$0xff]  ;;  %v254_v16 = vld [vmem:[#allocation11 + $0x40] sm:$0xff]  ;;  %v159_v17 = vld [vmem:[#allocation10 + $0x38] sm:$0xff] }
  0x67   :  { %2087 = vmatprep.subr.mxu0 %v2894_v0  ;;  %2122 = vmatprep.subr.mxu1 %v2894_v0  ;;  %v253_v18 = vld [vmem:[#allocation11 + $0x38] sm:$0xff]  ;;  %v158_v19 = vld [vmem:[#allocation10 + $0x30] sm:$0xff]  ;;  %v157_v21 = vld [vmem:[#allocation10 + $0x28] sm:$0xff]  ;;  %p2859_p1 = por %p2858_p0, %p2857_p13 }
  0x68   :  { %2088 = vmatpush3.msra.mxu0 %v165_v5  ;;  %2123 = vmatpush3.msra.mxu1 %v259_v6  ;;  %v252_v20 = vld [vmem:[#allocation11 + $0x30] sm:$0xff]  ;;  %v251_v22 = vld [vmem:[#allocation11 + $0x28] sm:$0xff]  ;;  %v156_v23 = vld [vmem:[#allocation10 + $0x20] sm:$0xff] }
  0x69   :  { %2089 = vmatprep.subr.mxu0 %v2894_v0  ;;  %2124 = vmatprep.subr.mxu1 %v2894_v0  ;;  %v250_v24 = vld [vmem:[#allocation11 + $0x20] sm:$0xff]  ;;  %v155_v25 = vld [vmem:[#allocation10 + $0x18] sm:$0xff]  ;;  %v154_v27 = vld [vmem:[#allocation10 + $0x10] sm:$0xff]  ;;  %p2860_p2 = pnand %p2859_p1, %p2853_p12 }
  0x6a   :  { %2090 = vmatpush3.msra.mxu0 %v164_v7  ;;  %2125 = vmatpush3.msra.mxu1 %v258_v8  ;;  %v249_v26 = vld [vmem:[#allocation11 + $0x18] sm:$0xff]  ;;  %v248_v28 = vld [vmem:[#allocation11 + $0x10] sm:$0xff]  ;;  %v153_v29 = vld [vmem:[#allocation10 + $0x8] sm:$0xff] }
  0x6b   :  { %2091 = vmatprep.subr.mxu0 %v2894_v0  ;;  %2126 = vmatprep.subr.mxu1 %v2894_v0  ;;  %v247_v30 = vld [vmem:[#allocation11 + $0x8] sm:$0xff]  ;;  %v152_v31 = vld [vmem:[#allocation10] sm:$0xff]  ;;  %v3042_v32 = vld [vmem:[#allocation5] sm:$0xff] }
  0x6c   :  { %2092 = vmatpush3.msra.mxu0 %v163_v9  ;;  %2127 = vmatpush3.msra.mxu1 %v257_v10  ;;  %v246_v33 = vld [vmem:[#allocation11] sm:$0xff]  ;;  %v354_v34 = vld [vmem:[#allocation13 + $0x78] sm:$0xff]  ;;  %v353_v36 = vld [vmem:[#allocation13 + $0x70] sm:$0xff] }
  0x6d   :  { %2093 = vmatprep.subr.mxu0 %v2894_v0  ;;  %2128 = vmatprep.subr.mxu1 %v2894_v0  ;;  %v448_v35 = vld [vmem:[#allocation7 + $0x78] sm:$0xff]  ;;  %v352_v37 = vld [vmem:[#allocation13 + $0x68] sm:$0xff]  ;;  %v447_v38 = vld [vmem:[#allocation7 + $0x70] sm:$0xff] }
  0x6e   :  { %2094 = vmatpush3.msra.mxu0 %v162_v11  ;;  %2129 = vmatpush3.msra.mxu1 %v256_v12  ;;  %v351_v39 = vld [vmem:[#allocation13 + $0x60] sm:$0xff]  ;;  %v446_v40 = vld [vmem:[#allocation7 + $0x68] sm:$0xff]  ;;  %v350_v41 = vld [vmem:[#allocation13 + $0x58] sm:$0xff] }
  0x6f   :  { %2095 = vmatprep.subr.mxu0 %v2894_v0  ;;  %2130 = vmatprep.subr.mxu1 %v2894_v0  ;;  %v445_v42 = vld [vmem:[#allocation7 + $0x60] sm:$0xff]  ;;  %v349_v43 = vld [vmem:[#allocation13 + $0x50] sm:$0xff]  ;;  %v444_v44 = vld [vmem:[#allocation7 + $0x58] sm:$0xff] }
  0x70   :  { %2096 = vmatpush3.msra.mxu0 %v161_v13  ;;  %2131 = vmatpush3.msra.mxu1 %v255_v14  ;;  %v348_v45 = vld [vmem:[#allocation13 + $0x48] sm:$0xff]  ;;  %v443_v46 = vld [vmem:[#allocation7 + $0x50] sm:$0xff]  ;;  %v347_v47 = vld [vmem:[#allocation13 + $0x40] sm:$0xff] }
  0x71   :  { %2097 = vmatprep.subr.mxu0 %v2894_v0  ;;  %2132 = vmatprep.subr.mxu1 %v2894_v0  ;;  %v442_v48 = vld [vmem:[#allocation7 + $0x48] sm:$0xff]  ;;  %v346_v49 = vld [vmem:[#allocation13 + $0x38] sm:$0xff]  ;;  %v441_v50 = vld [vmem:[#allocation7 + $0x40] sm:$0xff] }
  0x72   :  { %2098 = vmatpush3.msra.mxu0 %v160_v15  ;;  %2133 = vmatpush3.msra.mxu1 %v254_v16  ;;  %v345_v51 = vld [vmem:[#allocation13 + $0x30] sm:$0xff]  ;;  %v440_v52 = vld [vmem:[#allocation7 + $0x38] sm:$0xff]  ;;  %v344_v53 = vld [vmem:[#allocation13 + $0x28] sm:$0xff] }
  0x73   :  { %2099 = vmatprep.subr.mxu0 %v2894_v0  ;;  %2134 = vmatprep.subr.mxu1 %v2894_v0  ;;  %v439_v54 = vld [vmem:[#allocation7 + $0x30] sm:$0xff]  ;;  %v343_v55 = vld [vmem:[#allocation13 + $0x20] sm:$0xff]  ;;  %v438_v56 = vld [vmem:[#allocation7 + $0x28] sm:$0xff] }
  0x74   :  { %2100 = vmatpush3.msra.mxu0 %v159_v17  ;;  %2135 = vmatpush3.msra.mxu1 %v253_v18  ;;  %v342_v57 = vld [vmem:[#allocation13 + $0x18] sm:$0xff]  ;;  %v437_v58 = vld [vmem:[#allocation7 + $0x20] sm:$0xff]  ;;  %v341_v59 = vld [vmem:[#allocation13 + $0x10] sm:$0xff] }
  0x75   :  { %2101 = vmatprep.subr.mxu0 %v2894_v0  ;;  %2136 = vmatprep.subr.mxu1 %v2894_v0  ;;  %v436_v60 = vld [vmem:[#allocation7 + $0x18] sm:$0xff]  ;;  %v340_v61 = vld [vmem:[#allocation13 + $0x8] sm:$0xff]  ;;  %v339_v62 = vld [vmem:[#allocation13] sm:$0xff] }
  0x76   :  { %2102 = vmatpush3.msra.mxu0 %v158_v19  ;;  %2137 = vmatpush3.msra.mxu1 %v252_v20  ;;  %v542_v63 = vld [vmem:[#allocation8 + $0x78] sm:$0xff]  ;;  %v541_v1 = vld [vmem:[#allocation8 + $0x70] sm:$0xff]  ;;  %v540_v2 = vld [vmem:[#allocation8 + $0x68] sm:$0xff] }
  0x77   :  { %2103 = vmatprep.subr.mxu0 %v2894_v0  ;;  %2138 = vmatprep.subr.mxu1 %v2894_v0  ;;  %v539_v3 = vld [vmem:[#allocation8 + $0x60] sm:$0xff]  ;;  %v538_v4 = vld [vmem:[#allocation8 + $0x58] sm:$0xff]  ;;  %v537_v5 = vld [vmem:[#allocation8 + $0x50] sm:$0xff] }
  0x78   :  { %2104 = vmatpush3.msra.mxu0 %v157_v21  ;;  %2139 = vmatpush3.msra.mxu1 %v251_v22  ;;  %v536_v6 = vld [vmem:[#allocation8 + $0x48] sm:$0xff]  ;;  %v535_v7 = vld [vmem:[#allocation8 + $0x40] sm:$0xff]  ;;  %v534_v8 = vld [vmem:[#allocation8 + $0x38] sm:$0xff] }
  0x79   :  { %2105 = vmatprep.subr.mxu0 %v2894_v0  ;;  %2140 = vmatprep.subr.mxu1 %v2894_v0  ;;  %v533_v9 = vld [vmem:[#allocation8 + $0x30] sm:$0xff]  ;;  %v532_v10 = vld [vmem:[#allocation8 + $0x28] sm:$0xff]  ;;  %v531_v11 = vld [vmem:[#allocation8 + $0x20] sm:$0xff] }
  0x7a   :  { %2106 = vmatpush3.msra.mxu0 %v156_v23  ;;  %2141 = vmatpush3.msra.mxu1 %v250_v24  ;;  %v435_v12 = vld [vmem:[#allocation7 + $0x10] sm:$0xff]  ;;  %v530_v13 = vld [vmem:[#allocation8 + $0x18] sm:$0xff]  ;;  %v434_v14 = vld [vmem:[#allocation7 + $0x8] sm:$0xff] }
  0x7b   :  { %2107 = vmatprep.subr.mxu0 %v2894_v0  ;;  %2142 = vmatprep.subr.mxu1 %v2894_v0  ;;  %v529_v15 = vld [vmem:[#allocation8 + $0x10] sm:$0xff]  ;;  %v433_v16 = vld [vmem:[#allocation7] sm:$0xff]  ;;  %v528_v17 = vld [vmem:[#allocation8 + $0x8] sm:$0xff] }
  0x7c   :  { %2108 = vmatpush3.msra.mxu0 %v155_v25  ;;  %2143 = vmatpush3.msra.mxu1 %v249_v26  ;;  %v527_v18 = vld [vmem:[#allocation8] sm:$0xff]  ;;  %v1771_v19 = vld [vmem:[%s3400_s6] ss:$0 sm:$0xff] }
  0x7d   :  { %2109 = vmatprep.subr.mxu0 %v2894_v0  ;;  %2144 = vmatprep.subr.mxu1 %v2894_v0  ;;  %v1772_v20 = vld [vmem:[%s3402_s8] ss:$0 sm:$0xff] }
  0x7e   :  { %2110 = vmatpush3.msra.mxu0 %v154_v27  ;;  %2145 = vmatpush3.msra.mxu1 %v248_v28  ;;  %v3112_v24 = vld [vmem:[#allocation2] sm:$0xff] }
  0x7f   :  { %2111 = vmatprep.subr.mxu0 %v2894_v0  ;;  %2146 = vmatprep.subr.mxu1 %v2894_v0 }
  0x80   :  { %2112 = vmatpush3.msra.mxu0 %v153_v29  ;;  %2147 = vmatpush3.msra.mxu1 %v247_v30 }
  0x81   :  { %2113 = vmatprep.subr.mxu0 %v2894_v0  ;;  %2148 = vmatprep.subr.mxu1 %v2894_v0 }
  0x82   :  { %2114 = vmatpush3.msra.mxu0 %v152_v31  ;;  %2149 = vmatpush3.msra.mxu1 %v246_v33  ;;  %v631_v31 = vld [vmem:[#allocation14 + $0x78] sm:$0xff]  ;;  %v630_v33 = vld [vmem:[#allocation14 + $0x70] sm:$0xff] }
  0x83   :  { %2116 = vmatmul.mubr.f32.vlgmr.msra.gmra.mxu0 %v3042_v32  ;;  %2151 = vmatmul.mubr.f32.vlgmr.msra.gmra.mxu1 %v3042_v32 }
  0x84   :  { %2153 = vmatprep.subr.mxu0 %v2894_v0  ;;  %2188 = vmatprep.subr.mxu1 %v2894_v0 }
  0x85   :  { %2154 = vmatpush3.msra.mxu0 %v354_v34  ;;  %2189 = vmatpush3.msra.mxu1 %v448_v35  ;;  %v629_v34 = vld [vmem:[#allocation14 + $0x68] sm:$0xff]  ;;  %v628_v35 = vld [vmem:[#allocation14 + $0x60] sm:$0xff] }
  0x86   :  { %2155 = vmatprep.subr.mxu0 %v2894_v0  ;;  %2190 = vmatprep.subr.mxu1 %v2894_v0 }
  0x87   :  { %2156 = vmatpush3.msra.mxu0 %v353_v36  ;;  %2185 = vmatprep.mubr.msk.f32.mxu0 %vm2895_vm0, %v2894_v0  ;;  %v627_v36 = vld [vmem:[#allocation14 + $0x58] sm:$0xff] }
  0x88   :  { %2157 = vmatprep.subr.mxu0 %v2894_v0  ;;  %2191 = vmatpush3.msra.mxu1 %v447_v38  ;;  %v625_v38 = vld [vmem:[#allocation14 + $0x48] sm:$0xff] }
  0x89   :  { %2158 = vmatpush3.msra.mxu0 %v352_v37  ;;  %2192 = vmatprep.subr.mxu1 %v2894_v0  ;;  %v626_v37 = vld [vmem:[#allocation14 + $0x50] sm:$0xff] }
  0x8a   :  { %2159 = vmatprep.subr.mxu0 %v2894_v0  ;;  %2193 = vmatpush3.msra.mxu1 %v446_v40  ;;  %v623_v40 = vld [vmem:[#allocation14 + $0x38] sm:$0xff] }
  0x8b   :  { %2160 = vmatpush3.msra.mxu0 %v351_v39  ;;  %2194 = vmatprep.subr.mxu1 %v2894_v0  ;;  %v624_v39 = vld [vmem:[#allocation14 + $0x40] sm:$0xff] }
  0x8c   :  { %2161 = vmatprep.subr.mxu0 %v2894_v0  ;;  %2195 = vmatpush3.msra.mxu1 %v445_v42  ;;  %v621_v42 = vld [vmem:[#allocation14 + $0x28] sm:$0xff] }
  0x8d   :  { %2162 = vmatpush3.msra.mxu0 %v350_v41  ;;  %2196 = vmatprep.subr.mxu1 %v2894_v0  ;;  %v622_v41 = vld [vmem:[#allocation14 + $0x30] sm:$0xff] }
  0x8e   :  { %2163 = vmatprep.subr.mxu0 %v2894_v0  ;;  %2197 = vmatpush3.msra.mxu1 %v444_v44  ;;  %v619_v44 = vld [vmem:[#allocation14 + $0x18] sm:$0xff] }
  0x8f   :  { %2164 = vmatpush3.msra.mxu0 %v349_v43  ;;  %2198 = vmatprep.subr.mxu1 %v2894_v0  ;;  %v620_v43 = vld [vmem:[#allocation14 + $0x20] sm:$0xff] }
  0x90   :  { %2165 = vmatprep.subr.mxu0 %v2894_v0  ;;  %2199 = vmatpush3.msra.mxu1 %v443_v46  ;;  %v617_v46 = vld [vmem:[#allocation14 + $0x8] sm:$0xff] }
  0x91   :  { %2166 = vmatpush3.msra.mxu0 %v348_v45  ;;  %2200 = vmatprep.subr.mxu1 %v2894_v0  ;;  %v618_v45 = vld [vmem:[#allocation14 + $0x10] sm:$0xff] }
  0x92   :  { %2167 = vmatprep.subr.mxu0 %v2894_v0  ;;  %2201 = vmatpush3.msra.mxu1 %v442_v48  ;;  %v616_v48 = vld [vmem:[#allocation14] sm:$0xff] }
  0x93   :  { %2168 = vmatpush3.msra.mxu0 %v347_v47  ;;  %2202 = vmatprep.subr.mxu1 %v2894_v0 }
  0x94   :  { %2169 = vmatprep.subr.mxu0 %v2894_v0  ;;  %2203 = vmatpush3.msra.mxu1 %v441_v50  ;;  %v726_v50 = vld [vmem:[#allocation10 + $0xf8] sm:$0xff] }
  0x95   :  { %2170 = vmatpush3.msra.mxu0 %v346_v49  ;;  %2204 = vmatprep.subr.mxu1 %v2894_v0 }
  0x96   :  { %2171 = vmatprep.subr.mxu0 %v2894_v0  ;;  %2205 = vmatpush3.msra.mxu1 %v440_v52  ;;  %v725_v52 = vld [vmem:[#allocation10 + $0xf0] sm:$0xff] }
  0x97   :  { %2172 = vmatpush3.msra.mxu0 %v345_v51  ;;  %2206 = vmatprep.subr.mxu1 %v2894_v0  ;;  %v822_v51 = vld [vmem:[#allocation11 + $0xf8] sm:$0xff] }
  0x98   :  { %2173 = vmatprep.subr.mxu0 %v2894_v0  ;;  %2207 = vmatpush3.msra.mxu1 %v439_v54  ;;  %v724_v54 = vld [vmem:[#allocation10 + $0xe8] sm:$0xff] }
  0x99   :  { %2174 = vmatpush3.msra.mxu0 %v344_v53  ;;  %2208 = vmatprep.subr.mxu1 %v2894_v0  ;;  %v821_v53 = vld [vmem:[#allocation11 + $0xf0] sm:$0xff] }
  0x9a   :  { %2175 = vmatprep.subr.mxu0 %v2894_v0  ;;  %2209 = vmatpush3.msra.mxu1 %v438_v56  ;;  %v819_v56 = vld [vmem:[#allocation11 + $0xe0] sm:$0xff] }
  0x9b   :  { %2176 = vmatpush3.msra.mxu0 %v343_v55  ;;  %2210 = vmatprep.subr.mxu1 %v2894_v0  ;;  %v820_v55 = vld [vmem:[#allocation11 + $0xe8] sm:$0xff] }
  0x9c   :  { %2177 = vmatprep.subr.mxu0 %v2894_v0  ;;  %2211 = vmatpush3.msra.mxu1 %v437_v58  ;;  %v818_v58 = vld [vmem:[#allocation11 + $0xd8] sm:$0xff] }
  0x9d   :  { %2178 = vmatpush3.msra.mxu0 %v342_v57  ;;  %2212 = vmatprep.subr.mxu1 %v2894_v0  ;;  %v722_v57 = vld [vmem:[#allocation10 + $0xd8] sm:$0xff] }
  0x9e   :  { %2179 = vmatprep.subr.mxu0 %v2894_v0  ;;  %2213 = vmatpush3.msra.mxu1 %v436_v60  ;;  %v817_v60 = vld [vmem:[#allocation11 + $0xd0] sm:$0xff] }
  0x9f   :  { %2180 = vmatpush3.msra.mxu0 %v341_v59  ;;  %2214 = vmatprep.subr.mxu1 %v2894_v0  ;;  %v721_v59 = vld [vmem:[#allocation10 + $0xd0] sm:$0xff] }
  0xa0   :  { %2181 = vmatprep.subr.mxu0 %v2894_v0  ;;  %2220 = vmatprep.mubr.msk.f32.mxu1 %vm2895_vm0, %v2894_v0 }
  0xa1   :  { %2182 = vmatpush3.msra.mxu0 %v340_v61  ;;  %2215 = vmatpush3.msra.mxu1 %v435_v12  ;;  %v720_v61 = vld [vmem:[#allocation10 + $0xc8] sm:$0xff]  ;;  %v713_v12 = vld [vmem:[#allocation10 + $0x90] sm:$0xff] }
  0xa2   :  { %2183 = vmatprep.subr.mxu0 %v2894_v0  ;;  %2216 = vmatprep.subr.mxu1 %v2894_v0 }
  0xa3   :  { %2184 = vmatpush3.msra.mxu0 %v339_v62  ;;  %2217 = vmatpush3.msra.mxu1 %v434_v14  ;;  %v816_v62 = vld [vmem:[#allocation11 + $0xc8] sm:$0xff] }
  0xa4   :  { %2223 = vmatprep.subr.mxu0 %v2894_v0  ;;  %2186 = vmatmul.mubr.f32.vlgmr.msra.gmra.mxu0 %v3042_v32  ;;  %v712_v14 = vld [vmem:[#allocation10 + $0x88] sm:$0xff] }
  0xa5   :  { %2224 = vmatpush3.msra.mxu0 %v542_v63  ;;  %2255 = vmatprep.mubr.msk.f32.mxu0 %vm2895_vm0, %v2894_v0  ;;  %v719_v63 = vld [vmem:[#allocation10 + $0xc0] sm:$0xff] }
  0xa6   :  { %2225 = vmatprep.subr.mxu0 %v2894_v0  ;;  %2218 = vmatprep.subr.mxu1 %v2894_v0 }
  0xa7   :  { %2226 = vmatpush3.msra.mxu0 %v541_v1  ;;  %2219 = vmatpush3.msra.mxu1 %v433_v16  ;;  %v815_v1 = vld [vmem:[#allocation11 + $0xc0] sm:$0xff] }
  0xa8   :  { %2227 = vmatprep.subr.mxu0 %v2894_v0  ;;  %2258 = vmatprep.subr.mxu1 %v2894_v0  ;;  %v711_v16 = vld [vmem:[#allocation10 + $0x80] sm:$0xff] }
  0xa9   :  { %2228 = vmatpush3.msra.mxu0 %v540_v2  ;;  %v718_v2 = vld [vmem:[#allocation10 + $0xb8] sm:$0xff] }
  0xaa   :  { %2229 = vmatprep.subr.mxu0 %v2894_v0 }
  0xab   :  { %2230 = vmatpush3.msra.mxu0 %v539_v3  ;;  %v814_v3 = vld [vmem:[#allocation11 + $0xb8] sm:$0xff] }
  0xac   :  { %2231 = vmatprep.subr.mxu0 %v2894_v0 }
  0xad   :  { %2232 = vmatpush3.msra.mxu0 %v538_v4  ;;  %v717_v4 = vld [vmem:[#allocation10 + $0xb0] sm:$0xff] }
  0xae   :  { %2233 = vmatprep.subr.mxu0 %v2894_v0 }
  0xaf   :  { %2234 = vmatpush3.msra.mxu0 %v537_v5  ;;  %v813_v5 = vld [vmem:[#allocation11 + $0xb0] sm:$0xff] }
  0xb0   :  { %2235 = vmatprep.subr.mxu0 %v2894_v0 }
  0xb1   :  { %2236 = vmatpush3.msra.mxu0 %v536_v6  ;;  %v716_v6 = vld [vmem:[#allocation10 + $0xa8] sm:$0xff] }
  0xb2   :  { %2237 = vmatprep.subr.mxu0 %v2894_v0 }
  0xb3   :  { %2238 = vmatpush3.msra.mxu0 %v535_v7  ;;  %v812_v7 = vld [vmem:[#allocation11 + $0xa8] sm:$0xff] }
  0xb4   :  { %2239 = vmatprep.subr.mxu0 %v2894_v0 }
  0xb5   :  { %2240 = vmatpush3.msra.mxu0 %v534_v8  ;;  %v715_v8 = vld [vmem:[#allocation10 + $0xa0] sm:$0xff] }
  0xb6   :  { %2241 = vmatprep.subr.mxu0 %v2894_v0 }
  0xb7   :  { %2242 = vmatpush3.msra.mxu0 %v533_v9  ;;  %v811_v9 = vld [vmem:[#allocation11 + $0xa0] sm:$0xff] }
  0xb8   :  { %2243 = vmatprep.subr.mxu0 %v2894_v0 }
  0xb9   :  { %2244 = vmatpush3.msra.mxu0 %v532_v10  ;;  %v714_v10 = vld [vmem:[#allocation10 + $0x98] sm:$0xff] }
  0xba   :  { %2245 = vmatprep.subr.mxu0 %v2894_v0 }
  0xbb   :  { %2246 = vmatpush3.msra.mxu0 %v531_v11  ;;  %v810_v11 = vld [vmem:[#allocation11 + $0x98] sm:$0xff] }
  0xbc   :  { %2247 = vmatprep.subr.mxu0 %v2894_v0 }
  0xbd   :  { %2248 = vmatpush3.msra.mxu0 %v530_v13  ;;  %v809_v13 = vld [vmem:[#allocation11 + $0x90] sm:$0xff] }
  0xbe   :  { %2249 = vmatprep.subr.mxu0 %v2894_v0 }
  0xbf   :  { %2250 = vmatpush3.msra.mxu0 %v529_v15  ;;  %v808_v15 = vld [vmem:[#allocation11 + $0x88] sm:$0xff] }
  0xc0   :  { %2251 = vmatprep.subr.mxu0 %v2894_v0 }
  0xc1   :  { %2252 = vmatpush3.msra.mxu0 %v528_v17  ;;  %v807_v17 = vld [vmem:[#allocation11 + $0x80] sm:$0xff] }
  0xc2   :  { %2253 = vmatprep.subr.mxu0 %v2894_v0 }
  0xc3   :  { %2254 = vmatpush3.msra.mxu0 %v527_v18  ;;  %v1773_v18 = vld [vmem:[%s3404_s10] ss:$0 sm:$0xff] }
  0xc4   :  { %2293 = vmatprep.subr.mxu0 %v2894_v0 }
 0x143   :  { %v241_v21 = vpop.f32.mrf.mxu0  ;;  %v335_v23 = vpop.f32.mrf.mxu1 }
 0x144   :  { %v242_v22 = vadd.f32 %v1771_v19, %v241_v21  ;;  %v336_v26 = vadd.f32 %v1772_v20, %v335_v23  ;;  %v1774_v19 = vld [vmem:[%s3397_s3] ss:$0 sm:$0xff] }
 0x145   :  { %v2117_v25 = vpop.f32.mrf.mxu0  ;;  %v2152_v28 = vpop.f32.mrf.mxu1 }
 0x146   :  { %v245_v27 = vmax.f32 %v242_v22, 0.0  ;;  %v526_v29 = vmul.f32 %v336_v26, %v3112_v24 }
 0x148   :  { %v432_v30 = vmul.f32 %v245_v27, %v3112_v24  ;;  %2256 = vmatmul.mubr.f32.vlgmr.msra.gmra.mxu0 %v526_v29  ;;  %v1775_v29 = vld [vmem:[%s3406_s12] ss:$0 sm:$0xff] }
 0x149   :  { %2325 = vmatprep.mubr.msk.f32.mxu0 %vm2895_vm0, %v2894_v0  ;;  %2294 = vmatpush3.msra.mxu0 %v726_v50  ;;  %v1006_v50 = vld [vmem:[#allocation7 + $0xc0] sm:$0xff] }
 0x14a   :  { %2221 = vmatmul.mubr.f32.vlgmr.msra.gmra.mxu1 %v432_v30  ;;  %2295 = vmatprep.subr.mxu0 %v2894_v0 }
 0x14b   :  { %2259 = vmatpush3.msra.mxu1 %v631_v31  ;;  %2290 = vmatprep.mubr.msk.f32.mxu1 %vm2895_vm0, %v2894_v0 }
 0x14c   :  { %2260 = vmatprep.subr.mxu1 %v2894_v0  ;;  %2296 = vmatpush3.msra.mxu0 %v725_v52  ;;  %v1005_v52 = vld [vmem:[#allocation7 + $0xb8] sm:$0xff] }
 0x14d   :  { %2261 = vmatpush3.msra.mxu1 %v630_v33  ;;  %2297 = vmatprep.subr.mxu0 %v2894_v0 }
 0x14e   :  { %2262 = vmatprep.subr.mxu1 %v2894_v0  ;;  %2298 = vmatpush3.msra.mxu0 %v724_v54  ;;  %v1004_v54 = vld [vmem:[#allocation7 + $0xb0] sm:$0xff] }
 0x14f   :  { %2263 = vmatpush3.msra.mxu1 %v629_v34  ;;  %2299 = vmatprep.subr.mxu0 %v2894_v0 }
 0x150   :  { %2264 = vmatprep.subr.mxu1 %v2894_v0 }
 0x151   :  { %2265 = vmatpush3.msra.mxu1 %v628_v35  ;;  %v917_v35 = vld [vmem:[#allocation13 + $0xf8] sm:$0xff] }
 0x152   :  { %2266 = vmatprep.subr.mxu1 %v2894_v0 }
 0x153   :  { %2267 = vmatpush3.msra.mxu1 %v627_v36  ;;  %v1013_v36 = vld [vmem:[#allocation7 + $0xf8] sm:$0xff] }
 0x154   :  { %2268 = vmatprep.subr.mxu1 %v2894_v0 }
 0x155   :  { %2269 = vmatpush3.msra.mxu1 %v626_v37  ;;  %v916_v37 = vld [vmem:[#allocation13 + $0xf0] sm:$0xff] }
 0x156   :  { %2270 = vmatprep.subr.mxu1 %v2894_v0 }
 0x157   :  { %2271 = vmatpush3.msra.mxu1 %v625_v38  ;;  %v1012_v38 = vld [vmem:[#allocation7 + $0xf0] sm:$0xff] }
 0x158   :  { %2272 = vmatprep.subr.mxu1 %v2894_v0 }
 0x159   :  { %2273 = vmatpush3.msra.mxu1 %v624_v39  ;;  %v915_v39 = vld [vmem:[#allocation13 + $0xe8] sm:$0xff] }
 0x15a   :  { %2274 = vmatprep.subr.mxu1 %v2894_v0 }
 0x15b   :  { %2275 = vmatpush3.msra.mxu1 %v623_v40  ;;  %v1011_v40 = vld [vmem:[#allocation7 + $0xe8] sm:$0xff] }
 0x15c   :  { %2276 = vmatprep.subr.mxu1 %v2894_v0 }
 0x15d   :  { %2277 = vmatpush3.msra.mxu1 %v622_v41  ;;  %v914_v41 = vld [vmem:[#allocation13 + $0xe0] sm:$0xff] }
 0x15e   :  { %2278 = vmatprep.subr.mxu1 %v2894_v0 }
 0x15f   :  { %2279 = vmatpush3.msra.mxu1 %v621_v42  ;;  %v1010_v42 = vld [vmem:[#allocation7 + $0xe0] sm:$0xff] }
 0x160   :  { %2280 = vmatprep.subr.mxu1 %v2894_v0 }
 0x161   :  { %2281 = vmatpush3.msra.mxu1 %v620_v43  ;;  %v913_v43 = vld [vmem:[#allocation13 + $0xd8] sm:$0xff] }
 0x162   :  { %2282 = vmatprep.subr.mxu1 %v2894_v0 }
 0x163   :  { %2283 = vmatpush3.msra.mxu1 %v619_v44  ;;  %v1009_v44 = vld [vmem:[#allocation7 + $0xd8] sm:$0xff] }
 0x164   :  { %2284 = vmatprep.subr.mxu1 %v2894_v0  ;;  %v3133_v47 = vpop.f32.mrf.mxu0 }
 0x165   :  { %2285 = vmatpush3.msra.mxu1 %v618_v45  ;;  %v429_v22 = vadd.f32 %v1773_v18, %v3133_v47  ;;  %v912_v45 = vld [vmem:[#allocation13 + $0xd0] sm:$0xff]  ;;  %v911_v47 = vld [vmem:[#allocation13 + $0xc8] sm:$0xff]  ;;  %v998_v18 = vld [vmem:[#allocation7 + $0x80] sm:$0xff] }
 0x166   :  { %2286 = vmatprep.subr.mxu1 %v2894_v0  ;;  %v2187_v49 = vpop.f32.mrf.mxu0 }
 0x167   :  { %2287 = vmatpush3.msra.mxu1 %v617_v46  ;;  %v1008_v46 = vld [vmem:[#allocation7 + $0xd0] sm:$0xff]  ;;  %v910_v49 = vld [vmem:[#allocation13 + $0xc0] sm:$0xff] }
 0x168   :  { %2288 = vmatprep.subr.mxu1 %v2894_v0 }
 0x169   :  { %2289 = vmatpush3.msra.mxu1 %v616_v48  ;;  %v1007_v48 = vld [vmem:[#allocation7 + $0xc8] sm:$0xff] }
 0x16a   :  { %2291 = vmatmul.mubr.f32.vlgmr.msra.gmra.mxu1 %v3042_v32  ;;  %2328 = vmatprep.subr.mxu1 %v2894_v0  ;;  %v723_v32 = vld [vmem:[#allocation10 + $0xe0] sm:$0xff] }
 0x16b   :  { %2360 = vmatprep.mubr.msk.f32.mxu1 %vm2895_vm0, %v2894_v0  ;;  %2329 = vmatpush3.msra.mxu1 %v822_v51  ;;  %v909_v51 = vld [vmem:[#allocation13 + $0xb8] sm:$0xff] }
 0x16c   :  { %2330 = vmatprep.subr.mxu1 %v2894_v0  ;;  %2300 = vmatpush3.msra.mxu0 %v723_v32  ;;  %v1003_v32 = vld [vmem:[#allocation7 + $0xa8] sm:$0xff] }
 0x16d   :  { %2331 = vmatpush3.msra.mxu1 %v821_v53  ;;  %2301 = vmatprep.subr.mxu0 %v2894_v0  ;;  %v908_v53 = vld [vmem:[#allocation13 + $0xb0] sm:$0xff] }
 0x16e   :  { %2332 = vmatprep.subr.mxu1 %v2894_v0  ;;  %2302 = vmatpush3.msra.mxu0 %v722_v57  ;;  %v1002_v57 = vld [vmem:[#allocation7 + $0xa0] sm:$0xff] }
 0x16f   :  { %2333 = vmatpush3.msra.mxu1 %v820_v55  ;;  %2303 = vmatprep.subr.mxu0 %v2894_v0  ;;  %v907_v55 = vld [vmem:[#allocation13 + $0xa8] sm:$0xff] }
 0x170   :  { %2334 = vmatprep.subr.mxu1 %v2894_v0  ;;  %2304 = vmatpush3.msra.mxu0 %v721_v59  ;;  %v1001_v59 = vld [vmem:[#allocation7 + $0x98] sm:$0xff] }
 0x171   :  { %2335 = vmatpush3.msra.mxu1 %v819_v56  ;;  %2305 = vmatprep.subr.mxu0 %v2894_v0  ;;  %v906_v56 = vld [vmem:[#allocation13 + $0xa0] sm:$0xff] }
 0x172   :  { %2336 = vmatprep.subr.mxu1 %v2894_v0  ;;  %2306 = vmatpush3.msra.mxu0 %v720_v61  ;;  %v903_v61 = vld [vmem:[#allocation13 + $0x88] sm:$0xff] }
 0x173   :  { %2337 = vmatpush3.msra.mxu1 %v818_v58  ;;  %2307 = vmatprep.subr.mxu0 %v2894_v0  ;;  %v905_v58 = vld [vmem:[#allocation13 + $0x98] sm:$0xff] }
 0x174   :  { %2338 = vmatprep.subr.mxu1 %v2894_v0  ;;  %2308 = vmatpush3.msra.mxu0 %v719_v63  ;;  %v1109_v63 = vld [vmem:[#allocation8 + $0xf8] sm:$0xff] }
 0x175   :  { %2339 = vmatpush3.msra.mxu1 %v817_v60  ;;  %2309 = vmatprep.subr.mxu0 %v2894_v0  ;;  %v904_v60 = vld [vmem:[#allocation13 + $0x90] sm:$0xff] }
 0x176   :  { %2340 = vmatprep.subr.mxu1 %v2894_v0  ;;  %2310 = vmatpush3.msra.mxu0 %v718_v2  ;;  %v1107_v2 = vld [vmem:[#allocation8 + $0xe8] sm:$0xff] }
 0x177   :  { %2341 = vmatpush3.msra.mxu1 %v816_v62  ;;  %2311 = vmatprep.subr.mxu0 %v2894_v0  ;;  %v902_v62 = vld [vmem:[#allocation13 + $0x80] sm:$0xff] }
 0x178   :  { %2342 = vmatprep.subr.mxu1 %v2894_v0  ;;  %2312 = vmatpush3.msra.mxu0 %v717_v4  ;;  %v1105_v4 = vld [vmem:[#allocation8 + $0xd8] sm:$0xff] }
 0x179   :  { %2343 = vmatpush3.msra.mxu1 %v815_v1  ;;  %2313 = vmatprep.subr.mxu0 %v2894_v0  ;;  %v1108_v1 = vld [vmem:[#allocation8 + $0xf0] sm:$0xff] }
 0x17a   :  { %2344 = vmatprep.subr.mxu1 %v2894_v0  ;;  %2314 = vmatpush3.msra.mxu0 %v716_v6  ;;  %v1103_v6 = vld [vmem:[#allocation8 + $0xc8] sm:$0xff] }
 0x17b   :  { %2345 = vmatpush3.msra.mxu1 %v814_v3  ;;  %2315 = vmatprep.subr.mxu0 %v2894_v0  ;;  %v1106_v3 = vld [vmem:[#allocation8 + $0xe0] sm:$0xff] }
 0x17c   :  { %2346 = vmatprep.subr.mxu1 %v2894_v0  ;;  %2316 = vmatpush3.msra.mxu0 %v715_v8  ;;  %v1101_v8 = vld [vmem:[#allocation8 + $0xb8] sm:$0xff] }
 0x17d   :  { %2347 = vmatpush3.msra.mxu1 %v813_v5  ;;  %2317 = vmatprep.subr.mxu0 %v2894_v0  ;;  %v1104_v5 = vld [vmem:[#allocation8 + $0xd0] sm:$0xff] }
 0x17e   :  { %2348 = vmatprep.subr.mxu1 %v2894_v0  ;;  %2318 = vmatpush3.msra.mxu0 %v714_v10  ;;  %v1099_v10 = vld [vmem:[#allocation8 + $0xa8] sm:$0xff] }
 0x17f   :  { %2349 = vmatpush3.msra.mxu1 %v812_v7  ;;  %2319 = vmatprep.subr.mxu0 %v2894_v0  ;;  %v1102_v7 = vld [vmem:[#allocation8 + $0xc0] sm:$0xff] }
 0x180   :  { %2350 = vmatprep.subr.mxu1 %v2894_v0  ;;  %2320 = vmatpush3.msra.mxu0 %v713_v12  ;;  %v1097_v12 = vld [vmem:[#allocation8 + $0x98] sm:$0xff] }
 0x181   :  { %2351 = vmatpush3.msra.mxu1 %v811_v9  ;;  %2321 = vmatprep.subr.mxu0 %v2894_v0  ;;  %v1100_v9 = vld [vmem:[#allocation8 + $0xb0] sm:$0xff] }
 0x182   :  { %2352 = vmatprep.subr.mxu1 %v2894_v0  ;;  %2322 = vmatpush3.msra.mxu0 %v712_v14  ;;  %v1000_v14 = vld [vmem:[#allocation7 + $0x90] sm:$0xff] }
 0x183   :  { %2353 = vmatpush3.msra.mxu1 %v810_v11  ;;  %2323 = vmatprep.subr.mxu0 %v2894_v0  ;;  %v1098_v11 = vld [vmem:[#allocation8 + $0xa0] sm:$0xff] }
 0x184   :  { %2354 = vmatprep.subr.mxu1 %v2894_v0  ;;  %2324 = vmatpush3.msra.mxu0 %v711_v16  ;;  %v999_v16 = vld [vmem:[#allocation7 + $0x88] sm:$0xff] }
 0x185   :  { %2355 = vmatpush3.msra.mxu1 %v809_v13  ;;  %2363 = vmatprep.subr.mxu0 %v2894_v0  ;;  %v1096_v13 = vld [vmem:[#allocation8 + $0x90] sm:$0xff] }
 0x186   :  { %2356 = vmatprep.subr.mxu1 %v2894_v0 }
 0x187   :  { %2357 = vmatpush3.msra.mxu1 %v808_v15  ;;  %v1095_v15 = vld [vmem:[#allocation8 + $0x88] sm:$0xff] }
 0x188   :  { %2358 = vmatprep.subr.mxu1 %v2894_v0 }
 0x189   :  { %2359 = vmatpush3.msra.mxu1 %v807_v17  ;;  %v1094_v17 = vld [vmem:[#allocation8 + $0x80] sm:$0xff] }
 0x18a   :  { %2398 = vmatprep.subr.mxu1 %v2894_v0 }
 0x208   :  { %v609_v20 = vpop.f32.mrf.mxu0 }
 0x20a   :  { %v522_v21 = vpop.f32.mrf.mxu1  ;;  %v2257_v25 = vpop.f32.mrf.mxu0 }
 0x20b   :  { %v523_v23 = vadd.f32 %v1774_v19, %v522_v21  ;;  %v1777_v19 = vld [vmem:[%s3400_s6 + $0x1] ss:$0 sm:$0xff] }
 0x20c   :  { %v2222_v26 = vpop.f32.mrf.mxu1 }
 0x20d   :  { %v613_v27 = vadd.f32 %v609_v20, %v523_v23  ;;  %v1779_v20 = vld [vmem:[%s3402_s8 + $0x1] ss:$0 sm:$0xff] }
 0x20f   :  { %v3180_v28 = vadd.f32 %v613_v27, %v429_v22 }
 0x22a   :  { %v705_v30 = vpop.f32.mrf.mxu1 }
 0x22b   :  { %v706_v31 = vadd.f32 %v1775_v29, %v705_v30  ;;  %v615_v29 = vmax.f32 %v3180_v28, 0.0  ;;  %v1196_v28 = vld [vmem:[#allocation14 + $0xe0] sm:$0xff] }
 0x22c   :  { %v2292_v33 = vpop.f32.mrf.mxu1 }
 0x22d   :  { %v3185_v34 = vmax.f32 %v706_v31, 0.0 }
 0x22f   :  { %2326 = vmatmul.mubr.f32.vlgmr.msra.gmra.mxu0 %v3185_v34  ;;  %2361 = vmatmul.mubr.f32.vlgmr.msra.gmra.mxu1 %v3185_v34 }
 0x230   :  { %2364 = vmatpush3.msra.mxu0 %v917_v35  ;;  %2395 = vmatprep.mubr.msk.f32.mxu0 %vm2895_vm0, %v2894_v0  ;;  %v1199_v35 = vld [vmem:[#allocation14 + $0xf8] sm:$0xff] }
 0x231   :  { %2365 = vmatprep.subr.mxu0 %v2894_v0  ;;  %2399 = vmatpush3.msra.mxu1 %v1013_v36  ;;  %v1198_v36 = vld [vmem:[#allocation14 + $0xf0] sm:$0xff] }
 0x232   :  { %2366 = vmatpush3.msra.mxu0 %v916_v37  ;;  %2400 = vmatprep.subr.mxu1 %v2894_v0  ;;  %v1197_v37 = vld [vmem:[#allocation14 + $0xe8] sm:$0xff] }
 0x233   :  { %2367 = vmatprep.subr.mxu0 %v2894_v0  ;;  %2401 = vmatpush3.msra.mxu1 %v1012_v38  ;;  %v1194_v38 = vld [vmem:[#allocation14 + $0xd0] sm:$0xff] }
 0x234   :  { %2368 = vmatpush3.msra.mxu0 %v915_v39  ;;  %2402 = vmatprep.subr.mxu1 %v2894_v0  ;;  %v1193_v39 = vld [vmem:[#allocation14 + $0xc8] sm:$0xff] }
 0x235   :  { %2369 = vmatprep.subr.mxu0 %v2894_v0  ;;  %2403 = vmatpush3.msra.mxu1 %v1011_v40  ;;  %v1192_v40 = vld [vmem:[#allocation14 + $0xc0] sm:$0xff] }
 0x236   :  { %2370 = vmatpush3.msra.mxu0 %v914_v41  ;;  %2404 = vmatprep.subr.mxu1 %v2894_v0  ;;  %v1191_v41 = vld [vmem:[#allocation14 + $0xb8] sm:$0xff] }
 0x237   :  { %2371 = vmatprep.subr.mxu0 %v2894_v0  ;;  %2405 = vmatpush3.msra.mxu1 %v1010_v42  ;;  %v1190_v42 = vld [vmem:[#allocation14 + $0xb0] sm:$0xff] }
 0x238   :  { %2372 = vmatpush3.msra.mxu0 %v913_v43  ;;  %2406 = vmatprep.subr.mxu1 %v2894_v0  ;;  %v1189_v43 = vld [vmem:[#allocation14 + $0xa8] sm:$0xff] }
 0x239   :  { %2373 = vmatprep.subr.mxu0 %v2894_v0  ;;  %2407 = vmatpush3.msra.mxu1 %v1009_v44  ;;  %v1188_v44 = vld [vmem:[#allocation14 + $0xa0] sm:$0xff] }
 0x23a   :  { %2374 = vmatpush3.msra.mxu0 %v912_v45  ;;  %2408 = vmatprep.subr.mxu1 %v2894_v0  ;;  %v1187_v45 = vld [vmem:[#allocation14 + $0x98] sm:$0xff] }
 0x23b   :  { %2375 = vmatprep.subr.mxu0 %v2894_v0  ;;  %2409 = vmatpush3.msra.mxu1 %v1008_v46  ;;  %v1186_v46 = vld [vmem:[#allocation14 + $0x90] sm:$0xff] }
 0x23c   :  { %2376 = vmatpush3.msra.mxu0 %v911_v47  ;;  %2410 = vmatprep.subr.mxu1 %v2894_v0 }
 0x23d   :  { %2377 = vmatprep.subr.mxu0 %v2894_v0  ;;  %2411 = vmatpush3.msra.mxu1 %v1007_v48  ;;  %v1185_v48 = vld [vmem:[#allocation14 + $0x88] sm:$0xff] }
 0x23e   :  { %2378 = vmatpush3.msra.mxu0 %v910_v49  ;;  %2412 = vmatprep.subr.mxu1 %v2894_v0 }
 0x23f   :  { %2379 = vmatprep.subr.mxu0 %v2894_v0  ;;  %2413 = vmatpush3.msra.mxu1 %v1006_v50  ;;  %v1184_v50 = vld [vmem:[#allocation14 + $0x80] sm:$0xff] }
 0x240   :  { %2380 = vmatpush3.msra.mxu0 %v909_v51  ;;  %2414 = vmatprep.subr.mxu1 %v2894_v0  ;;  %v1295_v51 = vld [vmem:[#allocation10 + $0x178] sm:$0xff] }
 0x241   :  { %2381 = vmatprep.subr.mxu0 %v2894_v0  ;;  %2415 = vmatpush3.msra.mxu1 %v1005_v52  ;;  %v1391_v52 = vld [vmem:[#allocation11 + $0x178] sm:$0xff] }
 0x242   :  { %2382 = vmatpush3.msra.mxu0 %v908_v53  ;;  %2416 = vmatprep.subr.mxu1 %v2894_v0  ;;  %v1294_v53 = vld [vmem:[#allocation10 + $0x170] sm:$0xff] }
 0x243   :  { %2383 = vmatprep.subr.mxu0 %v2894_v0  ;;  %2417 = vmatpush3.msra.mxu1 %v1004_v54  ;;  %v1390_v54 = vld [vmem:[#allocation11 + $0x170] sm:$0xff] }
 0x244   :  { %2384 = vmatpush3.msra.mxu0 %v907_v55  ;;  %2418 = vmatprep.subr.mxu1 %v2894_v0  ;;  %v1293_v55 = vld [vmem:[#allocation10 + $0x168] sm:$0xff] }
 0x245   :  { %2385 = vmatprep.subr.mxu0 %v2894_v0  ;;  %2419 = vmatpush3.msra.mxu1 %v1003_v32  ;;  %v1389_v32 = vld [vmem:[#allocation11 + $0x168] sm:$0xff] }
 0x246   :  { %2386 = vmatpush3.msra.mxu0 %v906_v56  ;;  %2420 = vmatprep.subr.mxu1 %v2894_v0  ;;  %v1388_v56 = vld [vmem:[#allocation11 + $0x160] sm:$0xff] }
 0x247   :  { %2387 = vmatprep.subr.mxu0 %v2894_v0  ;;  %2421 = vmatpush3.msra.mxu1 %v1002_v57  ;;  %v1291_v57 = vld [vmem:[#allocation10 + $0x158] sm:$0xff] }
 0x248   :  { %2388 = vmatpush3.msra.mxu0 %v905_v58  ;;  %2422 = vmatprep.subr.mxu1 %v2894_v0  ;;  %v1387_v58 = vld [vmem:[#allocation11 + $0x158] sm:$0xff] }
 0x249   :  { %2389 = vmatprep.subr.mxu0 %v2894_v0  ;;  %2423 = vmatpush3.msra.mxu1 %v1001_v59  ;;  %v1290_v59 = vld [vmem:[#allocation10 + $0x150] sm:$0xff] }
 0x24a   :  { %2390 = vmatpush3.msra.mxu0 %v904_v60  ;;  %2424 = vmatprep.subr.mxu1 %v2894_v0  ;;  %v1386_v60 = vld [vmem:[#allocation11 + $0x150] sm:$0xff] }
 0x24b   :  { %2391 = vmatprep.subr.mxu0 %v2894_v0  ;;  %2430 = vmatprep.mubr.msk.f32.mxu1 %vm2895_vm0, %v2894_v0 }
 0x24c   :  { %2392 = vmatpush3.msra.mxu0 %v903_v61  ;;  %2425 = vmatpush3.msra.mxu1 %v1000_v14  ;;  %v1289_v61 = vld [vmem:[#allocation10 + $0x148] sm:$0xff] }
 0x24d   :  { %2393 = vmatprep.subr.mxu0 %v2894_v0  ;;  %2426 = vmatprep.subr.mxu1 %v2894_v0  ;;  %v1281_v14 = vld [vmem:[#allocation10 + $0x108] sm:$0xff] }
 0x24e   :  { %2394 = vmatpush3.msra.mxu0 %v902_v62  ;;  %2427 = vmatpush3.msra.mxu1 %v999_v16  ;;  %v1385_v62 = vld [vmem:[#allocation11 + $0x148] sm:$0xff]  ;;  %v1280_v16 = vld [vmem:[#allocation10 + $0x100] sm:$0xff] }
 0x24f   :  { %2396 = vmatmul.mubr.f32.vlgmr.msra.gmra.mxu0 %v3185_v34  ;;  %2433 = vmatprep.subr.mxu0 %v2894_v0 }
 0x250   :  { %2434 = vmatpush3.msra.mxu0 %v1109_v63  ;;  %2465 = vmatprep.mubr.msk.f32.mxu0 %vm2895_vm0, %v2894_v0  ;;  %v1288_v63 = vld [vmem:[#allocation10 + $0x140] sm:$0xff] }
 0x251   :  { %2435 = vmatprep.subr.mxu0 %v2894_v0  ;;  %2428 = vmatprep.subr.mxu1 %v2894_v0 }
 0x252   :  { %2436 = vmatpush3.msra.mxu0 %v1108_v1  ;;  %2429 = vmatpush3.msra.mxu1 %v998_v18  ;;  %v1384_v1 = vld [vmem:[#allocation11 + $0x140] sm:$0xff] }
 0x253   :  { %2437 = vmatprep.subr.mxu0 %v2894_v0  ;;  %2468 = vmatprep.subr.mxu1 %v2894_v0 }
 0x254   :  { %2438 = vmatpush3.msra.mxu0 %v1107_v2  ;;  %v1287_v2 = vld [vmem:[#allocation10 + $0x138] sm:$0xff] }
 0x255   :  { %2439 = vmatprep.subr.mxu0 %v2894_v0 }
 0x256   :  { %2440 = vmatpush3.msra.mxu0 %v1106_v3  ;;  %v1383_v3 = vld [vmem:[#allocation11 + $0x138] sm:$0xff] }
 0x257   :  { %2441 = vmatprep.subr.mxu0 %v2894_v0 }
 0x258   :  { %2442 = vmatpush3.msra.mxu0 %v1105_v4  ;;  %v1286_v4 = vld [vmem:[#allocation10 + $0x130] sm:$0xff] }
 0x259   :  { %2443 = vmatprep.subr.mxu0 %v2894_v0 }
 0x25a   :  { %2444 = vmatpush3.msra.mxu0 %v1104_v5  ;;  %v1382_v5 = vld [vmem:[#allocation11 + $0x130] sm:$0xff] }
 0x25b   :  { %2445 = vmatprep.subr.mxu0 %v2894_v0 }
 0x25c   :  { %2446 = vmatpush3.msra.mxu0 %v1103_v6  ;;  %v1285_v6 = vld [vmem:[#allocation10 + $0x128] sm:$0xff] }
 0x25d   :  { %2447 = vmatprep.subr.mxu0 %v2894_v0 }
 0x25e   :  { %2448 = vmatpush3.msra.mxu0 %v1102_v7  ;;  %v1381_v7 = vld [vmem:[#allocation11 + $0x128] sm:$0xff] }
 0x25f   :  { %2449 = vmatprep.subr.mxu0 %v2894_v0 }
 0x260   :  { %2450 = vmatpush3.msra.mxu0 %v1101_v8  ;;  %v1284_v8 = vld [vmem:[#allocation10 + $0x120] sm:$0xff] }
 0x261   :  { %2451 = vmatprep.subr.mxu0 %v2894_v0 }
 0x262   :  { %2452 = vmatpush3.msra.mxu0 %v1100_v9  ;;  %v1380_v9 = vld [vmem:[#allocation11 + $0x120] sm:$0xff] }
 0x263   :  { %2453 = vmatprep.subr.mxu0 %v2894_v0 }
 0x264   :  { %2454 = vmatpush3.msra.mxu0 %v1099_v10  ;;  %v1283_v10 = vld [vmem:[#allocation10 + $0x118] sm:$0xff] }
 0x265   :  { %2455 = vmatprep.subr.mxu0 %v2894_v0 }
 0x266   :  { %2456 = vmatpush3.msra.mxu0 %v1098_v11  ;;  %v1379_v11 = vld [vmem:[#allocation11 + $0x118] sm:$0xff] }
 0x267   :  { %2457 = vmatprep.subr.mxu0 %v2894_v0 }
 0x268   :  { %2458 = vmatpush3.msra.mxu0 %v1097_v12  ;;  %v1282_v12 = vld [vmem:[#allocation10 + $0x110] sm:$0xff] }
 0x269   :  { %2459 = vmatprep.subr.mxu0 %v2894_v0 }
 0x26a   :  { %2460 = vmatpush3.msra.mxu0 %v1096_v13  ;;  %v1378_v13 = vld [vmem:[#allocation11 + $0x110] sm:$0xff] }
 0x26b   :  { %2461 = vmatprep.subr.mxu0 %v2894_v0 }
 0x26c   :  { %2462 = vmatpush3.msra.mxu0 %v1095_v15  ;;  %v1377_v15 = vld [vmem:[#allocation11 + $0x108] sm:$0xff] }
 0x26d   :  { %2463 = vmatprep.subr.mxu0 %v2894_v0 }
 0x26e   :  { %2464 = vmatpush3.msra.mxu0 %v1094_v17  ;;  %v1376_v17 = vld [vmem:[#allocation11 + $0x100] sm:$0xff] }
 0x26f   :  { %2503 = vmatprep.subr.mxu0 %v2894_v0 }
 0x2ef   :  { %v801_v21 = vpop.f32.mrf.mxu0  ;;  %v897_v22 = vpop.f32.mrf.mxu1 }
 0x2f0   :  { %v802_v23 = vadd.f32 %v1777_v19, %v801_v21  ;;  %v898_v25 = vadd.f32 %v1779_v20, %v897_v22  ;;  %v1783_v19 = vld [vmem:[%s3397_s3 + $0x1] ss:$0 sm:$0xff] }
 0x2f1   :  { %v2327_v26 = vpop.f32.mrf.mxu0  ;;  %v2362_v27 = vpop.f32.mrf.mxu1  ;;  %v1781_v20 = vld [vmem:[%s3404_s10 + $0x1] ss:$0 sm:$0xff] }
 0x2f2   :  { %v805_v30 = vmax.f32 %v802_v23, 0.0  ;;  %v1092_v31 = vmul.f32 %v898_v25, %v3112_v24  ;;  %v1195_v24 = vld [vmem:[#allocation14 + $0xd8] sm:$0xff] }
 0x2f4   :  { %v996_v33 = vmul.f32 %v805_v30, %v615_v29  ;;  %2466 = vmatmul.mubr.f32.vlgmr.msra.gmra.mxu0 %v1092_v31  ;;  %v1785_v30 = vld [vmem:[%s3406_s12 + $0x1] ss:$0 sm:$0xff] }
 0x2f5   :  { %2535 = vmatprep.mubr.msk.f32.mxu0 %vm2895_vm0, %v2894_v0  ;;  %2504 = vmatpush3.msra.mxu0 %v1295_v51  ;;  %v1478_v51 = vld [vmem:[#allocation13 + $0x138] sm:$0xff] }
 0x2f6   :  { %2431 = vmatmul.mubr.f32.vlgmr.msra.gmra.mxu1 %v996_v33  ;;  %2505 = vmatprep.subr.mxu0 %v2894_v0 }
 0x2f7   :  { %2469 = vmatpush3.msra.mxu1 %v1199_v35  ;;  %2500 = vmatprep.mubr.msk.f32.mxu1 %vm2895_vm0, %v2894_v0 }
 0x2f8   :  { %2470 = vmatprep.subr.mxu1 %v2894_v0  ;;  %2506 = vmatpush3.msra.mxu0 %v1294_v53  ;;  %v1477_v53 = vld [vmem:[#allocation13 + $0x130] sm:$0xff] }
 0x2f9   :  { %2471 = vmatpush3.msra.mxu1 %v1198_v36  ;;  %2507 = vmatprep.subr.mxu0 %v2894_v0 }
 0x2fa   :  { %2472 = vmatprep.subr.mxu1 %v2894_v0  ;;  %2508 = vmatpush3.msra.mxu0 %v1293_v55  ;;  %v1476_v55 = vld [vmem:[#allocation13 + $0x128] sm:$0xff] }
 0x2fb   :  { %2473 = vmatpush3.msra.mxu1 %v1197_v37  ;;  %2509 = vmatprep.subr.mxu0 %v2894_v0  ;;  %v1486_v37 = vld [vmem:[#allocation13 + $0x178] sm:$0xff] }
 0x2fc   :  { %2474 = vmatprep.subr.mxu1 %v2894_v0 }
 0x2fd   :  { %2475 = vmatpush3.msra.mxu1 %v1196_v28  ;;  %v1582_v28 = vld [vmem:[#allocation7 + $0x178] sm:$0xff] }
 0x2fe   :  { %2476 = vmatprep.subr.mxu1 %v2894_v0 }
 0x2ff   :  { %2477 = vmatpush3.msra.mxu1 %v1195_v24  ;;  %v1485_v24 = vld [vmem:[#allocation13 + $0x170] sm:$0xff] }
 0x300   :  { %2478 = vmatprep.subr.mxu1 %v2894_v0 }
 0x301   :  { %2479 = vmatpush3.msra.mxu1 %v1194_v38  ;;  %v1581_v38 = vld [vmem:[#allocation7 + $0x170] sm:$0xff] }
 0x302   :  { %2480 = vmatprep.subr.mxu1 %v2894_v0 }
 0x303   :  { %2481 = vmatpush3.msra.mxu1 %v1193_v39  ;;  %v1484_v39 = vld [vmem:[#allocation13 + $0x168] sm:$0xff] }
 0x304   :  { %2482 = vmatprep.subr.mxu1 %v2894_v0 }
 0x305   :  { %2483 = vmatpush3.msra.mxu1 %v1192_v40  ;;  %v1580_v40 = vld [vmem:[#allocation7 + $0x168] sm:$0xff] }
 0x306   :  { %2484 = vmatprep.subr.mxu1 %v2894_v0 }
 0x307   :  { %2485 = vmatpush3.msra.mxu1 %v1191_v41  ;;  %v1483_v41 = vld [vmem:[#allocation13 + $0x160] sm:$0xff] }
 0x308   :  { %2486 = vmatprep.subr.mxu1 %v2894_v0 }
 0x309   :  { %2487 = vmatpush3.msra.mxu1 %v1190_v42  ;;  %v1579_v42 = vld [vmem:[#allocation7 + $0x160] sm:$0xff] }
 0x30a   :  { %2488 = vmatprep.subr.mxu1 %v2894_v0 }
 0x30b   :  { %2489 = vmatpush3.msra.mxu1 %v1189_v43  ;;  %v1482_v43 = vld [vmem:[#allocation13 + $0x158] sm:$0xff] }
 0x30c   :  { %2490 = vmatprep.subr.mxu1 %v2894_v0 }
 0x30d   :  { %2491 = vmatpush3.msra.mxu1 %v1188_v44  ;;  %v1578_v44 = vld [vmem:[#allocation7 + $0x158] sm:$0xff] }
 0x30e   :  { %2492 = vmatprep.subr.mxu1 %v2894_v0 }
 0x30f   :  { %v3268_v47 = vpop.f32.mrf.mxu0  ;;  %2493 = vmatpush3.msra.mxu1 %v1187_v45  ;;  %v1481_v45 = vld [vmem:[#allocation13 + $0x150] sm:$0xff] }
 0x310   :  { %2494 = vmatprep.subr.mxu1 %v2894_v0  ;;  %v993_v26 = vadd.f32 %v1781_v20, %v3268_v47  ;;  %v1480_v47 = vld [vmem:[#allocation13 + $0x148] sm:$0xff] }
 0x311   :  { %v2397_v49 = vpop.f32.mrf.mxu0  ;;  %2495 = vmatpush3.msra.mxu1 %v1186_v46  ;;  %v1577_v46 = vld [vmem:[#allocation7 + $0x150] sm:$0xff] }
 0x312   :  { %2496 = vmatprep.subr.mxu1 %v2894_v0  ;;  %v1479_v49 = vld [vmem:[#allocation13 + $0x140] sm:$0xff] }
 0x313   :  { %2497 = vmatpush3.msra.mxu1 %v1185_v48  ;;  %v1576_v48 = vld [vmem:[#allocation7 + $0x148] sm:$0xff] }
 0x314   :  { %2498 = vmatprep.subr.mxu1 %v2894_v0 }
 0x315   :  { %2499 = vmatpush3.msra.mxu1 %v1184_v50  ;;  %v1575_v50 = vld [vmem:[#allocation7 + $0x140] sm:$0xff] }
 0x316   :  { %2501 = vmatmul.mubr.f32.vlgmr.msra.gmra.mxu1 %v3185_v34  ;;  %2538 = vmatprep.subr.mxu1 %v2894_v0  ;;  %v1292_v34 = vld [vmem:[#allocation10 + $0x160] sm:$0xff] }
 0x317   :  { %2570 = vmatprep.mubr.msk.f32.mxu1 %vm2895_vm0, %v2894_v0  ;;  %2539 = vmatpush3.msra.mxu1 %v1391_v52  ;;  %v1574_v52 = vld [vmem:[#allocation7 + $0x138] sm:$0xff] }
 0x318   :  { %2540 = vmatprep.subr.mxu1 %v2894_v0  ;;  %2510 = vmatpush3.msra.mxu0 %v1292_v34  ;;  %v1475_v34 = vld [vmem:[#allocation13 + $0x120] sm:$0xff] }
 0x319   :  { %2541 = vmatpush3.msra.mxu1 %v1390_v54  ;;  %2511 = vmatprep.subr.mxu0 %v2894_v0  ;;  %v1573_v54 = vld [vmem:[#allocation7 + $0x130] sm:$0xff] }
 0x31a   :  { %2542 = vmatprep.subr.mxu1 %v2894_v0  ;;  %2512 = vmatpush3.msra.mxu0 %v1291_v57  ;;  %v1474_v57 = vld [vmem:[#allocation13 + $0x118] sm:$0xff] }
 0x31b   :  { %2543 = vmatpush3.msra.mxu1 %v1389_v32  ;;  %2513 = vmatprep.subr.mxu0 %v2894_v0  ;;  %v1572_v32 = vld [vmem:[#allocation7 + $0x128] sm:$0xff] }
 0x31c   :  { %2544 = vmatprep.subr.mxu1 %v2894_v0  ;;  %2514 = vmatpush3.msra.mxu0 %v1290_v59  ;;  %v1472_v59 = vld [vmem:[#allocation13 + $0x108] sm:$0xff] }
 0x31d   :  { %2545 = vmatpush3.msra.mxu1 %v1388_v56  ;;  %2515 = vmatprep.subr.mxu0 %v2894_v0  ;;  %v1571_v56 = vld [vmem:[#allocation7 + $0x120] sm:$0xff] }
 0x31e   :  { %2546 = vmatprep.subr.mxu1 %v2894_v0  ;;  %2516 = vmatpush3.msra.mxu0 %v1289_v61  ;;  %v1678_v61 = vld [vmem:[#allocation8 + $0x178] sm:$0xff] }
 0x31f   :  { %2547 = vmatpush3.msra.mxu1 %v1387_v58  ;;  %2517 = vmatprep.subr.mxu0 %v2894_v0  ;;  %v1473_v58 = vld [vmem:[#allocation13 + $0x110] sm:$0xff] }
 0x320   :  { %2548 = vmatprep.subr.mxu1 %v2894_v0  ;;  %2518 = vmatpush3.msra.mxu0 %v1288_v63  ;;  %v1676_v63 = vld [vmem:[#allocation8 + $0x168] sm:$0xff] }
 0x321   :  { %2549 = vmatpush3.msra.mxu1 %v1386_v60  ;;  %2519 = vmatprep.subr.mxu0 %v2894_v0  ;;  %v1471_v60 = vld [vmem:[#allocation13 + $0x100] sm:$0xff] }
 0x322   :  { %2550 = vmatprep.subr.mxu1 %v2894_v0  ;;  %2520 = vmatpush3.msra.mxu0 %v1287_v2  ;;  %v1674_v2 = vld [vmem:[#allocation8 + $0x158] sm:$0xff] }
 0x323   :  { %2551 = vmatpush3.msra.mxu1 %v1385_v62  ;;  %2521 = vmatprep.subr.mxu0 %v2894_v0  ;;  %v1677_v62 = vld [vmem:[#allocation8 + $0x170] sm:$0xff] }
 0x324   :  { %2552 = vmatprep.subr.mxu1 %v2894_v0  ;;  %2522 = vmatpush3.msra.mxu0 %v1286_v4  ;;  %v1672_v4 = vld [vmem:[#allocation8 + $0x148] sm:$0xff] }
 0x325   :  { %2553 = vmatpush3.msra.mxu1 %v1384_v1  ;;  %2523 = vmatprep.subr.mxu0 %v2894_v0  ;;  %v1675_v1 = vld [vmem:[#allocation8 + $0x160] sm:$0xff] }
 0x326   :  { %2554 = vmatprep.subr.mxu1 %v2894_v0  ;;  %2524 = vmatpush3.msra.mxu0 %v1285_v6  ;;  %v1670_v6 = vld [vmem:[#allocation8 + $0x138] sm:$0xff] }
 0x327   :  { %2555 = vmatpush3.msra.mxu1 %v1383_v3  ;;  %2525 = vmatprep.subr.mxu0 %v2894_v0  ;;  %v1673_v3 = vld [vmem:[#allocation8 + $0x150] sm:$0xff] }
 0x328   :  { %2556 = vmatprep.subr.mxu1 %v2894_v0  ;;  %2526 = vmatpush3.msra.mxu0 %v1284_v8  ;;  %v1668_v8 = vld [vmem:[#allocation8 + $0x128] sm:$0xff] }
 0x329   :  { %2557 = vmatpush3.msra.mxu1 %v1382_v5  ;;  %2527 = vmatprep.subr.mxu0 %v2894_v0  ;;  %v1671_v5 = vld [vmem:[#allocation8 + $0x140] sm:$0xff] }
 0x32a   :  { %2558 = vmatprep.subr.mxu1 %v2894_v0  ;;  %2528 = vmatpush3.msra.mxu0 %v1283_v10  ;;  %v1666_v10 = vld [vmem:[#allocation8 + $0x118] sm:$0xff] }
 0x32b   :  { %2559 = vmatpush3.msra.mxu1 %v1381_v7  ;;  %2529 = vmatprep.subr.mxu0 %v2894_v0  ;;  %v1669_v7 = vld [vmem:[#allocation8 + $0x130] sm:$0xff] }
 0x32c   :  { %2560 = vmatprep.subr.mxu1 %v2894_v0  ;;  %2530 = vmatpush3.msra.mxu0 %v1282_v12  ;;  %v1665_v12 = vld [vmem:[#allocation8 + $0x110] sm:$0xff] }
 0x32d   :  { %2561 = vmatpush3.msra.mxu1 %v1380_v9  ;;  %2531 = vmatprep.subr.mxu0 %v2894_v0  ;;  %v1667_v9 = vld [vmem:[#allocation8 + $0x120] sm:$0xff] }
 0x32e   :  { %2562 = vmatprep.subr.mxu1 %v2894_v0  ;;  %2532 = vmatpush3.msra.mxu0 %v1281_v14  ;;  %v1664_v14 = vld [vmem:[#allocation8 + $0x108] sm:$0xff] }
 0x32f   :  { %2563 = vmatpush3.msra.mxu1 %v1379_v11  ;;  %2533 = vmatprep.subr.mxu0 %v2894_v0  ;;  %v1570_v11 = vld [vmem:[#allocation7 + $0x118] sm:$0xff] }
 0x330   :  { %2564 = vmatprep.subr.mxu1 %v2894_v0  ;;  %2534 = vmatpush3.msra.mxu0 %v1280_v16  ;;  %v1663_v16 = vld [vmem:[#allocation8 + $0x100] sm:$0xff] }
 0x331   :  { %2565 = vmatpush3.msra.mxu1 %v1378_v13  ;;  %2573 = vmatprep.subr.mxu0 %v2894_v0  ;;  %v1569_v13 = vld [vmem:[#allocation7 + $0x110] sm:$0xff] }
 0x332   :  { %2566 = vmatprep.subr.mxu1 %v2894_v0 }
 0x333   :  { %2567 = vmatpush3.msra.mxu1 %v1377_v15  ;;  %v1568_v15 = vld [vmem:[#allocation7 + $0x108] sm:$0xff] }
 0x334   :  { %2568 = vmatprep.subr.mxu1 %v2894_v0 }
 0x335   :  { %2569 = vmatpush3.msra.mxu1 %v1376_v17  ;;  %v1567_v17 = vld [vmem:[#allocation7 + $0x100] sm:$0xff] }
 0x336   :  { %2608 = vmatprep.subr.mxu1 %v2894_v0 }
 0x3b4   :  { %v1176_v18 = vpop.f32.mrf.mxu0 }
 0x3b6   :  { %v1088_v21 = vpop.f32.mrf.mxu1  ;;  %v2467_v22 = vpop.f32.mrf.mxu0 }
 0x3b7   :  { %v1089_v23 = vadd.f32 %v1783_v19, %v1088_v21  ;;  %v1789_v19 = vld [vmem:[%s3402_s8 + $0x2] ss:$0 sm:$0xff] }
 0x3b8   :  { %v2432_v25 = vpop.f32.mrf.mxu1 }
 0x3b9   :  { %v1180_v27 = vadd.f32 %v1176_v18, %v1089_v23  ;;  %v1787_v18 = vld [vmem:[%s3400_s6 + $0x2] ss:$0 sm:$0xff] }
 0x3bb   :  { %v3316_v29 = vadd.f32 %v1180_v27, %v993_v26 }
 0x3bd   :  { %v1182_v27 = vmax.f32 %v3316_v29, 0.0 }
 0x3d6   :  { %v1274_v31 = vpop.f32.mrf.mxu1 }
 0x3d7   :  { %v1275_v33 = vadd.f32 %v1785_v30, %v1274_v31  ;;  %v2691_v31 = vld [vmem:[#allocation2] sm:$0xff] }
 0x3d8   :  { %v2502_v35 = vpop.f32.mrf.mxu1 }
 0x3d9   :  { %v3321_v36 = vmax.f32 %v1275_v33, 0.0 }
 0x3db   :  { %2536 = vmatmul.mubr.f32.vlgmr.msra.gmra.mxu0 %v3321_v36  ;;  %2571 = vmatmul.mubr.f32.vlgmr.msra.gmra.mxu1 %v3321_v36 }
 0x3dc   :  { %2574 = vmatpush3.msra.mxu0 %v1486_v37  ;;  %2605 = vmatprep.mubr.msk.f32.mxu0 %vm2895_vm0, %v2894_v0 }
 0x3dd   :  { %2575 = vmatprep.subr.mxu0 %v2894_v0  ;;  %2609 = vmatpush3.msra.mxu1 %v1582_v28  ;;  %v1793_v28 = vld [vmem:[%s3397_s3 + $0x2] ss:$0 sm:$0xff] }
 0x3de   :  { %2576 = vmatpush3.msra.mxu0 %v1485_v24  ;;  %2610 = vmatprep.subr.mxu1 %v2894_v0  ;;  %v1791_v24 = vld [vmem:[%s3404_s10 + $0x2] ss:$0 sm:$0xff] }
 0x3df   :  { %2577 = vmatprep.subr.mxu0 %v2894_v0  ;;  %2611 = vmatpush3.msra.mxu1 %v1581_v38 }
 0x3e0   :  { %2578 = vmatpush3.msra.mxu0 %v1484_v39  ;;  %2612 = vmatprep.subr.mxu1 %v2894_v0 }
 0x3e1   :  { %2579 = vmatprep.subr.mxu0 %v2894_v0  ;;  %2613 = vmatpush3.msra.mxu1 %v1580_v40 }
 0x3e2   :  { %2580 = vmatpush3.msra.mxu0 %v1483_v41  ;;  %2614 = vmatprep.subr.mxu1 %v2894_v0 }
 0x3e3   :  { %2581 = vmatprep.subr.mxu0 %v2894_v0  ;;  %2615 = vmatpush3.msra.mxu1 %v1579_v42 }
 0x3e4   :  { %2582 = vmatpush3.msra.mxu0 %v1482_v43  ;;  %2616 = vmatprep.subr.mxu1 %v2894_v0 }
 0x3e5   :  { %2583 = vmatprep.subr.mxu0 %v2894_v0  ;;  %2617 = vmatpush3.msra.mxu1 %v1578_v44 }
 0x3e6   :  { %2584 = vmatpush3.msra.mxu0 %v1481_v45  ;;  %2618 = vmatprep.subr.mxu1 %v2894_v0 }
 0x3e7   :  { %2585 = vmatprep.subr.mxu0 %v2894_v0  ;;  %2619 = vmatpush3.msra.mxu1 %v1577_v46 }
 0x3e8   :  { %2586 = vmatpush3.msra.mxu0 %v1480_v47  ;;  %2620 = vmatprep.subr.mxu1 %v2894_v0 }
 0x3e9   :  { %2587 = vmatprep.subr.mxu0 %v2894_v0  ;;  %2621 = vmatpush3.msra.mxu1 %v1576_v48 }
 0x3ea   :  { %2588 = vmatpush3.msra.mxu0 %v1479_v49  ;;  %2622 = vmatprep.subr.mxu1 %v2894_v0 }
 0x3eb   :  { %2589 = vmatprep.subr.mxu0 %v2894_v0  ;;  %2623 = vmatpush3.msra.mxu1 %v1575_v50 }
 0x3ec   :  { %2590 = vmatpush3.msra.mxu0 %v1478_v51  ;;  %2624 = vmatprep.subr.mxu1 %v2894_v0 }
 0x3ed   :  { %2591 = vmatprep.subr.mxu0 %v2894_v0  ;;  %2625 = vmatpush3.msra.mxu1 %v1574_v52 }
 0x3ee   :  { %2592 = vmatpush3.msra.mxu0 %v1477_v53  ;;  %2626 = vmatprep.subr.mxu1 %v2894_v0 }
 0x3ef   :  { %2593 = vmatprep.subr.mxu0 %v2894_v0  ;;  %2627 = vmatpush3.msra.mxu1 %v1573_v54 }
 0x3f0   :  { %2594 = vmatpush3.msra.mxu0 %v1476_v55  ;;  %2628 = vmatprep.subr.mxu1 %v2894_v0 }
 0x3f1   :  { %2595 = vmatprep.subr.mxu0 %v2894_v0  ;;  %2629 = vmatpush3.msra.mxu1 %v1572_v32 }
 0x3f2   :  { %2596 = vmatpush3.msra.mxu0 %v1475_v34  ;;  %2630 = vmatprep.subr.mxu1 %v2894_v0 }
 0x3f3   :  { %2597 = vmatprep.subr.mxu0 %v2894_v0  ;;  %2631 = vmatpush3.msra.mxu1 %v1571_v56 }
 0x3f4   :  { %2598 = vmatpush3.msra.mxu0 %v1474_v57  ;;  %2632 = vmatprep.subr.mxu1 %v2894_v0 }
 0x3f5   :  { %2599 = vmatprep.subr.mxu0 %v2894_v0  ;;  %2640 = vmatprep.mubr.msk.f32.mxu1 %vm2895_vm0, %v2894_v0 }
 0x3f6   :  { %2600 = vmatpush3.msra.mxu0 %v1473_v58  ;;  %2633 = vmatpush3.msra.mxu1 %v1570_v11 }
 0x3f7   :  { %2601 = vmatprep.subr.mxu0 %v2894_v0  ;;  %2634 = vmatprep.subr.mxu1 %v2894_v0 }
 0x3f8   :  { %2602 = vmatpush3.msra.mxu0 %v1472_v59  ;;  %2635 = vmatpush3.msra.mxu1 %v1569_v13 }
 0x3f9   :  { %2603 = vmatprep.subr.mxu0 %v2894_v0  ;;  %2636 = vmatprep.subr.mxu1 %v2894_v0 }
 0x3fa   :  { %2604 = vmatpush3.msra.mxu0 %v1471_v60  ;;  %2637 = vmatpush3.msra.mxu1 %v1568_v15 }
 0x3fb   :  { %2606 = vmatmul.mubr.f32.vlgmr.msra.gmra.mxu0 %v3321_v36  ;;  %2643 = vmatprep.subr.mxu0 %v2894_v0 }
 0x3fc   :  { %2644 = vmatpush3.msra.mxu0 %v1678_v61  ;;  %2675 = vmatprep.mubr.msk.f32.mxu0 %vm2895_vm0, %v2894_v0 }
 0x3fd   :  { %2645 = vmatprep.subr.mxu0 %v2894_v0  ;;  %2638 = vmatprep.subr.mxu1 %v2894_v0 }
 0x3fe   :  { %2646 = vmatpush3.msra.mxu0 %v1677_v62  ;;  %2639 = vmatpush3.msra.mxu1 %v1567_v17 }
 0x3ff   :  { %2647 = vmatprep.subr.mxu0 %v2894_v0 }
 0x400   :  { %2648 = vmatpush3.msra.mxu0 %v1676_v63 }
 0x401   :  { %2649 = vmatprep.subr.mxu0 %v2894_v0 }
 0x402   :  { %2650 = vmatpush3.msra.mxu0 %v1675_v1 }
 0x403   :  { %2651 = vmatprep.subr.mxu0 %v2894_v0 }
 0x404   :  { %2652 = vmatpush3.msra.mxu0 %v1674_v2 }
 0x405   :  { %2653 = vmatprep.subr.mxu0 %v2894_v0 }
 0x406   :  { %2654 = vmatpush3.msra.mxu0 %v1673_v3 }
 0x407   :  { %2655 = vmatprep.subr.mxu0 %v2894_v0 }
 0x408   :  { %2656 = vmatpush3.msra.mxu0 %v1672_v4 }
 0x409   :  { %2657 = vmatprep.subr.mxu0 %v2894_v0 }
 0x40a   :  { %2658 = vmatpush3.msra.mxu0 %v1671_v5 }
 0x40b   :  { %2659 = vmatprep.subr.mxu0 %v2894_v0 }
 0x40c   :  { %2660 = vmatpush3.msra.mxu0 %v1670_v6 }
 0x40d   :  { %2661 = vmatprep.subr.mxu0 %v2894_v0 }
 0x40e   :  { %2662 = vmatpush3.msra.mxu0 %v1669_v7 }
 0x40f   :  { %2663 = vmatprep.subr.mxu0 %v2894_v0 }
 0x410   :  { %2664 = vmatpush3.msra.mxu0 %v1668_v8 }
 0x411   :  { %2665 = vmatprep.subr.mxu0 %v2894_v0 }
 0x412   :  { %2666 = vmatpush3.msra.mxu0 %v1667_v9 }
 0x413   :  { %2667 = vmatprep.subr.mxu0 %v2894_v0 }
 0x414   :  { %2668 = vmatpush3.msra.mxu0 %v1666_v10 }
 0x415   :  { %2669 = vmatprep.subr.mxu0 %v2894_v0 }
 0x416   :  { %2670 = vmatpush3.msra.mxu0 %v1665_v12 }
 0x417   :  { %2671 = vmatprep.subr.mxu0 %v2894_v0 }
 0x418   :  { %2672 = vmatpush3.msra.mxu0 %v1664_v14 }
 0x419   :  { %2673 = vmatprep.subr.mxu0 %v2894_v0 }
 0x41a   :  { %2674 = vmatpush3.msra.mxu0 %v1663_v16 }
 0x49b   :  { %v1370_v20 = vpop.f32.mrf.mxu0  ;;  %v1466_v21 = vpop.f32.mrf.mxu1 }
 0x49c   :  { %v1371_v22 = vadd.f32 %v1787_v18, %v1370_v20  ;;  %v1467_v23 = vadd.f32 %v1789_v19, %v1466_v21 }
 0x49d   :  { %v2537_v25 = vpop.f32.mrf.mxu0  ;;  %v2572_v26 = vpop.f32.mrf.mxu1 }
 0x49e   :  { %v1374_v30 = vmax.f32 %v1371_v22, 0.0  ;;  %v1661_v0 = vmul.f32 %v2691_v31, %v1467_v23 }
 0x4a0   :  { %v1565_v33 = vmul.f32 %v1374_v30, %v1182_v27  ;;  %2676 = vmatmul.mubr.f32.vlgmr.msra.gmra.mxu0 %v1661_v0 }
 0x4a2   :  { %2641 = vmatmul.mubr.f32.vlgmr.msra.gmra.mxu1 %v1565_v33 }
 0x4bb   :  { %v1561_v35 = vpop.f32.mrf.mxu0 }
 0x4bc   :  { %v1562_v41 = vadd.f32 %v1791_v24, %v1561_v35 }
 0x4bd   :  { %v2607_v36 = vpop.f32.mrf.mxu0 }
 0x560   :  { %v1745_v37 = vpop.f32.mrf.mxu0 }
 0x562   :  { %v1657_v38 = vpop.f32.mrf.mxu1  ;;  %v2677_v39 = vpop.f32.mrf.mxu0 }
 0x563   :  { %v1658_v29 = vadd.f32 %v1793_v28, %v1657_v38 }
 0x564   :  { %v2642_v40 = vpop.f32.mrf.mxu1 }
 0x565   :  { %v1749_v42 = vadd.f32 %v1745_v37, %v1658_v29 }
 0x567   :  { %v1750_v43 = vadd.f32 %v1749_v42, %v1562_v41 }
 0x569   :  { %1751 = vst [vmem:[#allocation16] sm:$0xff] %v1750_v43 }
 0x56a   :  { %2863 = shalt.err (!%p2860_p2)
}
 0x56b   :  { %1761 = dma.vmem_to_hbm [thread:$0]  %s1759_s11, 128, %s3407_s13, [#allocation4]  }
 0x56c   :  { %2882 = dma.done.wait [#allocation4], 128  }
 0x56d   :  { %2883 = vsyncadd [#allocation4], 4294967168 }
 0x56e   :  { %1765 = vsyncpa [#allocation3], 1 }
 0x56f   :  { %1766 = vsyncpa [#allocation6], 1 }
 0x570   :  { %1767 = vsyncpa [#allocation9], 1 }
 0x571   :  { %1768 = vsyncpa [#allocation12], 1 }
 0x572   :  { %1769 = vsyncpa [#allocation15], 1 }
 0x573   :  { %1770 = vsyncpa [#allocation4], 1 }

</bundles_post_ra>
